<compile_context>
chip_gen: v7x
topology: tpu7x:2x2x1
jax: 0.10.0
libtpu: 0.0.40
codegen_flags: <defaults>
</compile_context>

<pallas_src>
import functools

import numpy as np
import jax
import jax.numpy as jnp
from jax.experimental import pallas as pl
from jax.experimental.pallas import tpu as pltpu

NEG_SLOPE = 0.01      # F.leaky_relu default negative slope
MASK_VAL = -1e30      # "-inf" for masked (non-existent) edges


# ----------------------------------------------------------------------------
# helpers
# ----------------------------------------------------------------------------
def _round_up(x, m):
    return ((x + m - 1) // m) * m


def _choose_tiling(n):
    """Return (n_pad, tile_dst, tile_src).

    Small graphs: a single block. Large graphs: bound the (tile_dst, tile_src)
    f32 score slab so it fits v7x's 64 MiB VMEM, and keep the dst grid > 1 tile
    so both v7x TensorCores get work. N is padded so every tile divides evenly.
    """
    if n <= 512:
        n_pad = _round_up(n, 8)
        return n_pad, n_pad, n_pad
    if n <= 4096:
        n_pad = _round_up(n, 512)
        return n_pad, 512, 512
    n_pad = _round_up(n, 1024)
    return n_pad, 512, 1024


def _vmem_limit_bytes():
    """Generation-dependent scoped-VMEM limit with compiler headroom."""
    cap = None
    try:
        cap = int(getattr(pltpu.get_tpu_info(), "vmem_capacity_bytes", 0)) or None
    except Exception:
        cap = None
    if cap is None:
        try:
            kind = jax.devices()[0].device_kind.lower()
        except Exception:
            kind = ""
        cap = 64 * 1024 * 1024 if "v7" in kind else 128 * 1024 * 1024
    # ~51 MiB on v7x (64 MiB physical), capped at 100 MiB on v5e/v6e (128 MiB).
    return min((cap * 4) // 5, 100 * 1024 * 1024)


def _bf16_eup_ok():
    """bf16 exp only on generations with a bf16 EUP (v6e / v7x)."""
    try:
        kind = jax.devices()[0].device_kind.lower()
    except Exception:
        return False
    return not any(t in kind for t in ("v2", "v3", "v4", "v5"))


# ----------------------------------------------------------------------------
# kernel 1: hoisted projection  z_aug = h @ [W_cat | W@a_src | W@a_dst]
# ----------------------------------------------------------------------------
def _proj_kernel(h_ref, w_ref, z_ref):
    z_ref[...] = jnp.dot(h_ref[...], w_ref[...],
                         preferred_element_type=jnp.float32)


def _project(h_bf, w_aug_bf, tile):
    n_pad, din = h_bf.shape
    dz = w_aug_bf.shape[1]
    return pl.pallas_call(
        _proj_kernel,
        out_shape=jax.ShapeDtypeStruct((n_pad, dz), jnp.float32),
        grid_spec=pltpu.PrefetchScalarGridSpec(
            num_scalar_prefetch=0,
            grid=(n_pad // tile,),
            in_specs=[pl.BlockSpec((tile, din), lambda i: (i, 0)),
                      pl.BlockSpec((din, dz), lambda i: (0, 0))],   # resident
            out_specs=pl.BlockSpec((tile, dz), lambda i: (i, 0)),
        ),
        compiler_params=pltpu.CompilerParams(
            dimension_semantics=("parallel",),
            vmem_limit_bytes=_vmem_limit_bytes(),
        ),
    )(h_bf, w_aug_bf)


# ----------------------------------------------------------------------------
# kernel 2: masked attention + online softmax + aggregation
# ----------------------------------------------------------------------------
def _gat_attn_kernel(z_src_ref, s_src_ref, s_dst_ref, adj_ref, out_ref,
                     m_sc, l_sc, acc_sc, *,
                     num_heads, out_dim, apply_elu, exp_bf16):
    """One (dst-tile, src-tile) step of the online-softmax GAT layer.

    z_src_ref : (Ts, H*Do)  bf16  source node features (per head, concatenated)
    s_src_ref : (H, Ts)     f32   z_src · a_src  (lane-major, no transpose)
    s_dst_ref : (Td, H)     f32   z_dst · a_dst
    adj_ref   : (Td, Ts)    int8  adj[i, j] != 0  <=>  edge j -> i
    out_ref   : (Td, H*Do)        concatenated head outputs (written at last j)
    m/l/acc   : VMEM scratch      running max / denom / weighted sum per head
    """
    j = pl.program_id(1)

    @pl.when(j == 0)
    def _init():
        m_sc[...] = jnp.full(m_sc.shape, MASK_VAL, dtype=jnp.float32)
        l_sc[...] = jnp.zeros(l_sc.shape, dtype=jnp.float32)
        acc_sc[...] = jnp.zeros(acc_sc.shape, dtype=jnp.float32)

    mask = adj_ref[...] != 0                        # (Td, Ts) bool, no i8->f32
    s_dst = s_dst_ref[...]                          # (Td, H)
    z_src = z_src_ref[...]                          # (Ts, H*Do) bf16

    for h in range(num_heads):
        hs = slice(h * out_dim, (h + 1) * out_dim)
        # scores[i, j] = z[i]·a_dst + z[j]·a_src ; src scores are lane-major.
        scores = s_dst[:, h:h + 1] + s_src_ref[h:h + 1, :]      # (Td, Ts)
        scores = jnp.maximum(scores, NEG_SLOPE * scores)        # leaky_relu
        e = jnp.where(mask, scores, jnp.float32(MASK_VAL))

        # --- online softmax update (masked entries underflow to exactly 0,
        #     all-masked tiles get wiped later by corr == 0) ---
        m_prev = m_sc[:, h:h + 1]                               # (Td, 1)
        m_new = jnp.maximum(m_prev, jnp.max(e, axis=-1, keepdims=True))
        corr = jnp.exp(m_prev - m_new)                          # (Td, 1)
        if exp_bf16:
            p = jnp.exp((e - m_new).astype(jnp.bfloat16))       # bf16 EUP
            p_sum = jnp.sum(p.astype(jnp.float32), axis=-1, keepdims=True)
            p_mm = p
        else:
            p = jnp.exp(e - m_new)
            p_sum = jnp.sum(p, axis=-1, keepdims=True)
            p_mm = p.astype(jnp.bfloat16)
        l_sc[:, h:h + 1] = corr * l_sc[:, h:h + 1] + p_sum
        acc_sc[:, hs] = corr * acc_sc[:, hs] + jnp.dot(
            p_mm, z_src[:, hs], preferred_element_type=jnp.float32)
        m_sc[:, h:h + 1] = m_new

    @pl.when(j == pl.num_programs(1) - 1)
    def _finalize():
        # exact normalization (tiny (Td, H) tensor; guard against empty rows)
        inv = 1.0 / jnp.maximum(l_sc[...], jnp.float32(1e-30))
        for h in range(num_heads):
            hs = slice(h * out_dim, (h + 1) * out_dim)
            acc_sc[:, hs] = acc_sc[:, hs] * inv[:, h:h + 1]
        res = acc_sc[...]
        if apply_elu:
            # F.elu (alpha=1); clamp before exp so positives don't hit inf.
            res = jnp.where(res > 0, res, jnp.exp(jnp.minimum(res, 0.0)) - 1.0)
        out_ref[...] = res.astype(out_ref.dtype)   # single lane-dense store


# ----------------------------------------------------------------------------
# layer wrapper
# ----------------------------------------------------------------------------
def multi_head_gat_layer(h, w, a_src, a_dst, adj_i8, *, tiles, apply_elu,
                         out_dtype):
    """h: (N_pad, Din); w: (H, Din, Dout); a_src/a_dst: (H, 1, Dout);
    adj_i8: (N_pad, N_pad) int8 with adj[dst, src] != 0 per edge src -> dst.
    Returns (N_pad, H*Dout) == torch.cat(head_outs, dim=1)."""
    n_pad, tile_dst, tile_src = tiles
    N, Din = h.shape
    assert N == n_pad
    H, _, Do = w.shape
    hd = H * Do

    # Fuse heads + fold both attention projections into one augmented weight:
    #   w_aug = [W_0 | ... | W_{H-1} | W@a_src | W@a_dst]   (Din, H*Do + 2H)
    w_cat = jnp.transpose(w, (1, 0, 2)).reshape(Din, hd)
    w_asrc = jnp.einsum('hdo,ho->dh', w, a_src[:, 0, :])          # (Din, H)
    w_adst = jnp.einsum('hdo,ho->dh', w, a_dst[:, 0, :])          # (Din, H)
    w_aug = jnp.concatenate([w_cat, w_asrc, w_adst], axis=1)

    # Hoisted projection: one wide MXU matmul, run ONCE (not per dst tile).
    h_bf = h.astype(jnp.bfloat16)
    z_aug = _project(h_bf, w_aug.astype(jnp.bfloat16), tile_dst)  # (N, hd+2H) f32
    z_cat = z_aug[:, :hd].astype(jnp.bfloat16)                    # values (N, hd)
    s_src = jnp.transpose(z_aug[:, hd:hd + H])                    # (H, N) lane-major
    s_dst = z_aug[:, hd + H:hd + 2 * H]                           # (N, H)

    kernel = functools.partial(_gat_attn_kernel, num_heads=H, out_dim=Do,
                               apply_elu=apply_elu, exp_bf16=_bf16_eup_ok())
    grid = (n_pad // tile_dst, n_pad // tile_src)   # src (reduction) axis last
    return pl.pallas_call(
        kernel,
        out_shape=jax.ShapeDtypeStruct((n_pad, hd), out_dtype),
        grid_spec=pltpu.PrefetchScalarGridSpec(
            num_scalar_prefetch=0,
            grid=grid,
            in_specs=[
                pl.BlockSpec((tile_src, hd), lambda i, j: (j, 0)),      # z (src)
                pl.BlockSpec((H, tile_src), lambda i, j: (0, j)),       # s_src
                pl.BlockSpec((tile_dst, H), lambda i, j: (i, 0)),       # s_dst
                pl.BlockSpec((tile_dst, tile_src), lambda i, j: (i, j)),  # adj i8
                # NOTE: if the adj stream becomes DMA-exposed on very large
                # graphs, add pipeline_mode=pl.Buffered(3) / bit-pack adjacency.
            ],
            out_specs=pl.BlockSpec((tile_dst, hd), lambda i, j: (i, 0)),
            scratch_shapes=[
                pltpu.VMEM((tile_dst, H), jnp.float32),    # running max
                pltpu.VMEM((tile_dst, H), jnp.float32),    # running denom
                pltpu.VMEM((tile_dst, hd), jnp.float32),   # running weighted sum
            ],
        ),
        compiler_params=pltpu.CompilerParams(
            dimension_semantics=("parallel", "arbitrary"),
            vmem_limit_bytes=_vmem_limit_bytes(),
        ),
    )(z_cat, s_src, s_dst, adj_i8)


def gat_forward(h, params, adj_i8):
    N = h.shape[0]
    tiles = _choose_tiling(N)
    n_pad = tiles[0]
    if n_pad != N:
        # Padded rows have no in-edges (uniform junk output, sliced off) and
        # padded src columns are masked, so they contribute exactly zero.
        h = jnp.pad(h, ((0, n_pad - N), (0, 0)))
        adj_i8 = jnp.pad(adj_i8, ((0, n_pad - N), (0, n_pad - N)))
    # layer1 (multi-head, merge='cat') + F.elu fused into the kernel epilogue;
    # emitted in bf16 since layer 2 consumes bf16 MXU operands anyway.
    h1 = multi_head_gat_layer(h, params["w1"], params["a1_src"],
                              params["a1_dst"], adj_i8, tiles=tiles,
                              apply_elu=True, out_dtype=jnp.bfloat16)
    # layer2 (single head)
    h2 = multi_head_gat_layer(h1, params["w2"], params["a2_src"],
                              params["a2_dst"], adj_i8, tiles=tiles,
                              apply_elu=False, out_dtype=jnp.float32)
    return h2[:N]


def init_gat_params(key, in_dim, hidden_dim, out_dim, num_heads):
    """Xavier-normal init with gain = calculate_gain('relu') = sqrt(2),
    matching GATLayer.reset_parameters (deterministic, synthetic weights)."""
    gain = float(np.sqrt(2.0))

    def xav(k, shape, fan_in, fan_out):
        std = gain * np.sqrt(2.0 / (fan_in + fan_out))
        return std * jax.random.normal(k, shape, dtype=jnp.float32)

    k1, k2, k3, k4 = jax.random.split(key, 4)
    # fc weights stored already transposed to (Din, Dout) for the kernel
    w1 = xav(k1, (num_heads, in_dim, hidden_dim), in_dim, hidden_dim)
    a1 = xav(k2, (num_heads, 1, 2 * hidden_dim), 2 * hidden_dim, 1)
    w2 = xav(k3, (1, hidden_dim * num_heads, out_dim),
             hidden_dim * num_heads, out_dim)
    a2 = xav(k4, (1, 1, 2 * out_dim), 2 * out_dim, 1)
    return dict(
        w1=w1, a1_src=a1[..., :hidden_dim], a1_dst=a1[..., hidden_dim:],
        w2=w2, a2_src=a2[..., :out_dim], a2_dst=a2[..., out_dim:],
    )


if __name__ == "__main__":
    # TODO(synk): word_tokenize / pandas / dgl.DGLGraph construction is
    # host-side preprocessing; replaced by a deterministic synthetic graph
    # (ring + chord, made bidirectional exactly like build_graph()).
    N = 16
    in_dim, hidden_dim, out_dim, num_heads = 16, 8, 4, 2

    src = np.arange(N)
    dst_ring = (src + 1) % N
    dst_chord = (src + 3) % N
    u = np.concatenate([src, src, dst_ring, dst_chord])   # u -> v and v -> u
    v = np.concatenate([dst_ring, dst_chord, src, src])
    adj_np = np.zeros((N, N), dtype=np.int8)
    adj_np[v, u] = 1                                       # adj[dst, src] = 1
    # invariant the softmax relies on: every node has >= 1 in-edge
    assert int(adj_np.sum(axis=1).min()) >= 1
    adj = jnp.asarray(adj_np)                              # int8 adjacency

    key = jax.random.PRNGKey(0)
    kp, kh = jax.random.split(key)
    params = init_gat_params(kp, in_dim, hidden_dim, out_dim, num_heads)
    h = jax.random.normal(kh, (N, in_dim), dtype=jnp.float32)

    out = jax.jit(gat_forward)(h, params, adj)
    out = jax.block_until_ready(out)
    assert out.shape == (N, out_dim), out.shape
    assert bool(jnp.all(jnp.isfinite(out)))
    print("KERNEL_OK")
</pallas_src>

<mosaic_0001>
module attributes {stable_mosaic.version = 11 : i64} {
  func.func @_proj_kernel(%arg0: i32, %arg1: memref<16x16xbf16, #tpu.memory_space<vmem>>, %arg2: memref<16x20xbf16, #tpu.memory_space<vmem>>, %arg3: memref<16x20xf32, #tpu.memory_space<vmem>>) attributes {dimension_semantics = [#tpu.dimension_semantics<parallel>], iteration_bounds = array<i64: 1>, scalar_prefetch = 0 : i64, scratch_operands = 0 : i64, tpu.core_type = #tpu.core_type<tc>, window_params = [{transform_indices = @transform_0, window_bounds = array<i64: 16, 16>}, {pipeline_mode = #tpu.pipeline_mode<synchronous>, transform_indices = @transform_1, window_bounds = array<i64: 16, 20>}, {transform_indices = @transform_2, window_bounds = array<i64: 16, 20>}]} {
    %c0 = arith.constant 0 : index
    %c0_0 = arith.constant 0 : index
    %0 = vector.load %arg1[%c0, %c0_0] : memref<16x16xbf16, #tpu.memory_space<vmem>>, vector<16x16xbf16>
    %c0_1 = arith.constant 0 : index
    %c0_2 = arith.constant 0 : index
    %1 = vector.load %arg2[%c0_1, %c0_2] : memref<16x20xbf16, #tpu.memory_space<vmem>>, vector<16x20xbf16>
    %cst = arith.constant dense<0.000000e+00> : vector<16x20xf32>
    %2 = tpu.matmul %0, %1, %cst {dimension_numbers = #tpu.dot_dimension_numbers<[1], [0], [0], [1], [0, 0, 1, 1], [], []>} : vector<16x16xbf16>, vector<16x20xbf16>, vector<16x20xf32> -> vector<16x20xf32>
    %c0_3 = arith.constant 0 : index
    %c0_4 = arith.constant 0 : index
    %3 = vector.load %arg3[%c0_3, %c0_4] : memref<16x20xf32, #tpu.memory_space<vmem>>, vector<16x20xf32>
    tpu.vector_store %arg3[%c0_3, %c0_4], %2 {strides = array<i32>} : memref<16x20xf32, #tpu.memory_space<vmem>>, vector<16x20xf32>,
    return
  }
  func.func @transform_0(%arg0: i32) -> (i32, i32) {
    %c0_i32 = arith.constant 0 : i32
    %c0_i32_0 = arith.constant 0 : i32
    return %arg0, %c0_i32 : i32, i32
  }
  func.func @transform_1(%arg0: i32) -> (i32, i32) {
    %c0_i32 = arith.constant 0 : i32
    %c0_i32_0 = arith.constant 0 : i32
    %c0_i32_1 = arith.constant 0 : i32
    return %c0_i32, %c0_i32_0 : i32, i32
  }
  func.func @transform_2(%arg0: i32) -> (i32, i32) {
    %c0_i32 = arith.constant 0 : i32
    %c0_i32_0 = arith.constant 0 : i32
    return %arg0, %c0_i32 : i32, i32
  }
}

module attributes {stable_mosaic.version = 11 : i64} {
  func.func @_gat_attn_kernel(%arg0: i32, %arg1: i32, %arg2: memref<16x16xbf16, #tpu.memory_space<vmem>>, %arg3: memref<2x16xf32, #tpu.memory_space<vmem>>, %arg4: memref<16x2xf32, #tpu.memory_space<vmem>>, %arg5: memref<16x16xi8, #tpu.memory_space<vmem>>, %arg6: memref<16x16xbf16, #tpu.memory_space<vmem>>, %arg7: memref<16x2xf32, #tpu.memory_space<vmem>>, %arg8: memref<16x2xf32, #tpu.memory_space<vmem>>, %arg9: memref<16x16xf32, #tpu.memory_space<vmem>>) attributes {dimension_semantics = [#tpu.dimension_semantics<parallel>, #tpu.dimension_semantics<arbitrary>], iteration_bounds = array<i64: 1, 1>, scalar_prefetch = 0 : i64, scratch_operands = 3 : i64, tpu.core_type = #tpu.core_type<tc>, window_params = [{transform_indices = @transform_0, window_bounds = array<i64: 16, 16>}, {transform_indices = @transform_1, window_bounds = array<i64: 2, 16>}, {transform_indices = @transform_2, window_bounds = array<i64: 16, 2>}, {transform_indices = @transform_3, window_bounds = array<i64: 16, 16>}, {transform_indices = @transform_4, window_bounds = array<i64: 16, 16>}]} {
    %c0_i32 = arith.constant 0 : i32
    %0 = arith.cmpi eq, %arg1, %c0_i32 : i32
    %1 = arith.extui %0 : i1 to i32
    %c0_i32_0 = arith.constant 0 : i32
    %2 = arith.cmpi ne, %1, %c0_i32_0 : i32
    scf.if %2 {
      %cst_43 = arith.constant -1.000000e+30 : f32
      %81 = vector.broadcast %cst_43 : f32 to vector<16x2xf32>
      %c0_44 = arith.constant 0 : index
      %c0_45 = arith.constant 0 : index
      %82 = vector.load %arg7[%c0_44, %c0_45] : memref<16x2xf32, #tpu.memory_space<vmem>>, vector<16x2xf32>
      tpu.vector_store %arg7[%c0_44, %c0_45], %81 {strides = array<i32>} : memref<16x2xf32, #tpu.memory_space<vmem>>, vector<16x2xf32>,
      %cst_46 = arith.constant 0.000000e+00 : f32
      %83 = vector.broadcast %cst_46 : f32 to vector<16x2xf32>
      %c0_47 = arith.constant 0 : index
      %c0_48 = arith.constant 0 : index
      %84 = vector.load %arg8[%c0_47, %c0_48] : memref<16x2xf32, #tpu.memory_space<vmem>>, vector<16x2xf32>
      tpu.vector_store %arg8[%c0_47, %c0_48], %83 {strides = array<i32>} : memref<16x2xf32, #tpu.memory_space<vmem>>, vector<16x2xf32>,
      %cst_49 = arith.constant 0.000000e+00 : f32
      %85 = vector.broadcast %cst_49 : f32 to vector<16x16xf32>
      %c0_50 = arith.constant 0 : index
      %c0_51 = arith.constant 0 : index
      %86 = vector.load %arg9[%c0_50, %c0_51] : memref<16x16xf32, #tpu.memory_space<vmem>>, vector<16x16xf32>
      tpu.vector_store %arg9[%c0_50, %c0_51], %85 {strides = array<i32>} : memref<16x16xf32, #tpu.memory_space<vmem>>, vector<16x16xf32>,
    } else {
    }
    %c0 = arith.constant 0 : index
    %c0_1 = arith.constant 0 : index
    %3 = vector.load %arg5[%c0, %c0_1] : memref<16x16xi8, #tpu.memory_space<vmem>>, vector<16x16xi8>
    %c0_i8 = arith.constant 0 : i8
    %4 = vector.broadcast %c0_i8 : i8 to vector<16x16xi8>
    %5 = arith.cmpi ne, %3, %4 : vector<16x16xi8>
    %c0_2 = arith.constant 0 : index
    %c0_3 = arith.constant 0 : index
    %6 = vector.load %arg4[%c0_2, %c0_3] : memref<16x2xf32, #tpu.memory_space<vmem>>, vector<16x2xf32>
    %c0_4 = arith.constant 0 : index
    %c0_5 = arith.constant 0 : index
    %7 = vector.load %arg2[%c0_4, %c0_5] : memref<16x16xbf16, #tpu.memory_space<vmem>>, vector<16x16xbf16>
    %8 = vector.extract_strided_slice %6 {offsets = [0, 0], sizes = [16, 1], strides = [1, 1]} : vector<16x2xf32> to vector<16x1xf32>
    %c0_6 = arith.constant 0 : index
    %c0_7 = arith.constant 0 : index
    %9 = vector.load %arg3[%c0_6, %c0_7] : memref<2x16xf32, #tpu.memory_space<vmem>>, vector<1x16xf32>
    %10 = vector.broadcast %8 : vector<16x1xf32> to vector<16x16xf32>
    %11 = vector.broadcast %9 : vector<1x16xf32> to vector<16x16xf32>
    %12 = arith.addf %10, %11 : vector<16x16xf32>
    %cst = arith.constant 0.00999999977 : f32
    %13 = vector.broadcast %cst : f32 to vector<16x16xf32>
    %14 = arith.mulf %13, %12 : vector<16x16xf32>
    %15 = arith.maximumf %12, %14 : vector<16x16xf32>
    %cst_8 = arith.constant -1.000000e+30 : f32
    %16 = vector.broadcast %cst_8 : f32 to vector<16x16xf32>
    %17 = arith.select %5, %15, %16 : vector<16x16xi1>, vector<16x16xf32>
    %c0_9 = arith.constant 0 : index
    %c0_10 = arith.constant 0 : index
    %18 = vector.load %arg7[%c0_9, %c0_10] : memref<16x2xf32, #tpu.memory_space<vmem>>, vector<16x1xf32>
    %cst_11 = arith.constant dense<0xFF800000> : vector<16xf32>
    %19 = vector.multi_reduction <maximumf>, %17, %cst_11 [1] : vector<16x16xf32> to vector<16xf32>
    %20 = vector.shape_cast %19 : vector<16xf32> to vector<16x1xf32>
    %21 = arith.maximumf %18, %20 : vector<16x1xf32>
    %22 = arith.subf %18, %21 : vector<16x1xf32>
    %23 = math.exp %22 : vector<16x1xf32>
    %24 = vector.broadcast %21 : vector<16x1xf32> to vector<16x16xf32>
    %25 = arith.subf %17, %24 : vector<16x16xf32>
    %26 = arith.truncf %25 : vector<16x16xf32> to vector<16x16xbf16>
    %27 = math.exp %26 : vector<16x16xbf16>
    %28 = arith.extf %27 : vector<16x16xbf16> to vector<16x16xf32>
    %cst_12 = arith.constant dense<0.000000e+00> : vector<16xf32>
    %29 = vector.multi_reduction <add>, %28, %cst_12 [1] : vector<16x16xf32> to vector<16xf32>
    %30 = vector.shape_cast %29 : vector<16xf32> to vector<16x1xf32>
    %c0_13 = arith.constant 0 : index
    %c0_14 = arith.constant 0 : index
    %31 = vector.load %arg8[%c0_13, %c0_14] : memref<16x2xf32, #tpu.memory_space<vmem>>, vector<16x1xf32>
    %32 = arith.mulf %23, %31 : vector<16x1xf32>
    %33 = arith.addf %32, %30 : vector<16x1xf32>
    %c0_15 = arith.constant 0 : index
    %c0_16 = arith.constant 0 : index
    %34 = vector.load %arg8[%c0_15, %c0_16] : memref<16x2xf32, #tpu.memory_space<vmem>>, vector<16x1xf32>
    tpu.vector_store %arg8[%c0_15, %c0_16], %33 {strides = array<i32>} : memref<16x2xf32, #tpu.memory_space<vmem>>, vector<16x1xf32>,
    %c0_17 = arith.constant 0 : index
    %c0_18 = arith.constant 0 : index
    %35 = vector.load %arg9[%c0_17, %c0_18] : memref<16x16xf32, #tpu.memory_space<vmem>>, vector<16x8xf32>
    %36 = vector.broadcast %23 : vector<16x1xf32> to vector<16x8xf32>
    %37 = arith.mulf %36, %35 : vector<16x8xf32>
    %38 = vector.extract_strided_slice %7 {offsets = [0, 0], sizes = [16, 8], strides = [1, 1]} : vector<16x16xbf16> to vector<16x8xbf16>
    %cst_19 = arith.constant dense<0.000000e+00> : vector<16x8xf32>
    %39 = tpu.matmul %27, %38, %cst_19 {dimension_numbers = #tpu.dot_dimension_numbers<[1], [0], [0], [1], [0, 0, 1, 1], [], []>} : vector<16x16xbf16>, vector<16x8xbf16>, vector<16x8xf32> -> vector<16x8xf32>
    %40 = arith.addf %37, %39 : vector<16x8xf32>
    %c0_20 = arith.constant 0 : index
    %c0_21 = arith.constant 0 : index
    %41 = vector.load %arg9[%c0_20, %c0_21] : memref<16x16xf32, #tpu.memory_space<vmem>>, vector<16x8xf32>
    tpu.vector_store %arg9[%c0_20, %c0_21], %40 {strides = array<i32>} : memref<16x16xf32, #tpu.memory_space<vmem>>, vector<16x8xf32>,
    %c0_22 = arith.constant 0 : index
    %c0_23 = arith.constant 0 : index
    %42 = vector.load %arg7[%c0_22, %c0_23] : memref<16x2xf32, #tpu.memory_space<vmem>>, vector<16x1xf32>
    tpu.vector_store %arg7[%c0_22, %c0_23], %21 {strides = array<i32>} : memref<16x2xf32, #tpu.memory_space<vmem>>, vector<16x1xf32>,
    %43 = vector.extract_strided_slice %6 {offsets = [0, 1], sizes = [16, 1], strides = [1, 1]} : vector<16x2xf32> to vector<16x1xf32>
    %c1 = arith.constant 1 : index
    %c0_24 = arith.constant 0 : index
    %44 = vector.load %arg3[%c1, %c0_24] : memref<2x16xf32, #tpu.memory_space<vmem>>, vector<1x16xf32>
    %45 = vector.broadcast %43 : vector<16x1xf32> to vector<16x16xf32>
    %46 = vector.broadcast %44 : vector<1x16xf32> to vector<16x16xf32>
    %47 = arith.addf %45, %46 : vector<16x16xf32>
    %cst_25 = arith.constant 0.00999999977 : f32
    %48 = vector.broadcast %cst_25 : f32 to vector<16x16xf32>
    %49 = arith.mulf %48, %47 : vector<16x16xf32>
    %50 = arith.maximumf %47, %49 : vector<16x16xf32>
    %cst_26 = arith.constant -1.000000e+30 : f32
    %51 = vector.broadcast %cst_26 : f32 to vector<16x16xf32>
    %52 = arith.select %5, %50, %51 : vector<16x16xi1>, vector<16x16xf32>
    %c0_27 = arith.constant 0 : index
    %c1_28 = arith.constant 1 : index
    %53 = vector.load %arg7[%c0_27, %c1_28] : memref<16x2xf32, #tpu.memory_space<vmem>>, vector<16x1xf32>
    %cst_29 = arith.constant dense<0xFF800000> : vector<16xf32>
    %54 = vector.multi_reduction <maximumf>, %52, %cst_29 [1] : vector<16x16xf32> to vector<16xf32>
    %55 = vector.shape_cast %54 : vector<16xf32> to vector<16x1xf32>
    %56 = arith.maximumf %53, %55 : vector<16x1xf32>
    %57 = arith.subf %53, %56 : vector<16x1xf32>
    %58 = math.exp %57 : vector<16x1xf32>
    %59 = vector.broadcast %56 : vector<16x1xf32> to vector<16x16xf32>
    %60 = arith.subf %52, %59 : vector<16x16xf32>
    %61 = arith.truncf %60 : vector<16x16xf32> to vector<16x16xbf16>
    %62 = math.exp %61 : vector<16x16xbf16>
    %63 = arith.extf %62 : vector<16x16xbf16> to vector<16x16xf32>
    %cst_30 = arith.constant dense<0.000000e+00> : vector<16xf32>
    %64 = vector.multi_reduction <add>, %63, %cst_30 [1] : vector<16x16xf32> to vector<16xf32>
    %65 = vector.shape_cast %64 : vector<16xf32> to vector<16x1xf32>
    %c0_31 = arith.constant 0 : index
    %c1_32 = arith.constant 1 : index
    %66 = vector.load %arg8[%c0_31, %c1_32] : memref<16x2xf32, #tpu.memory_space<vmem>>, vector<16x1xf32>
    %67 = arith.mulf %58, %66 : vector<16x1xf32>
    %68 = arith.addf %67, %65 : vector<16x1xf32>
    %c0_33 = arith.constant 0 : index
    %c1_34 = arith.constant 1 : index
    %69 = vector.load %arg8[%c0_33, %c1_34] : memref<16x2xf32, #tpu.memory_space<vmem>>, vector<16x1xf32>
    tpu.vector_store %arg8[%c0_33, %c1_34], %68 {strides = array<i32>} : memref<16x2xf32, #tpu.memory_space<vmem>>, vector<16x1xf32>,
    %c0_35 = arith.constant 0 : index
    %c8 = arith.constant 8 : index
    %70 = vector.load %arg9[%c0_35, %c8] : memref<16x16xf32, #tpu.memory_space<vmem>>, vector<16x8xf32>
    %71 = vector.broadcast %58 : vector<16x1xf32> to vector<16x8xf32>
    %72 = arith.mulf %71, %70 : vector<16x8xf32>
    %73 = vector.extract_strided_slice %7 {offsets = [0, 8], sizes = [16, 8], strides = [1, 1]} : vector<16x16xbf16> to vector<16x8xbf16>
    %cst_36 = arith.constant dense<0.000000e+00> : vector<16x8xf32>
    %74 = tpu.matmul %62, %73, %cst_36 {dimension_numbers = #tpu.dot_dimension_numbers<[1], [0], [0], [1], [0, 0, 1, 1], [], []>} : vector<16x16xbf16>, vector<16x8xbf16>, vector<16x8xf32> -> vector<16x8xf32>
    %75 = arith.addf %72, %74 : vector<16x8xf32>
    %c0_37 = arith.constant 0 : index
    %c8_38 = arith.constant 8 : index
    %76 = vector.load %arg9[%c0_37, %c8_38] : memref<16x16xf32, #tpu.memory_space<vmem>>, vector<16x8xf32>
    tpu.vector_store %arg9[%c0_37, %c8_38], %75 {strides = array<i32>} : memref<16x16xf32, #tpu.memory_space<vmem>>, vector<16x8xf32>,
    %c0_39 = arith.constant 0 : index
    %c1_40 = arith.constant 1 : index
    %77 = vector.load %arg7[%c0_39, %c1_40] : memref<16x2xf32, #tpu.memory_space<vmem>>, vector<16x1xf32>
    tpu.vector_store %arg7[%c0_39, %c1_40], %56 {strides = array<i32>} : memref<16x2xf32, #tpu.memory_space<vmem>>, vector<16x1xf32>,
    %c0_i32_41 = arith.constant 0 : i32
    %78 = arith.cmpi eq, %arg1, %c0_i32_41 : i32
    %79 = arith.extui %78 : i1 to i32
    %c0_i32_42 = arith.constant 0 : i32
    %80 = arith.cmpi ne, %79, %c0_i32_42 : i32
    scf.if %80 {
      %c0_43 = arith.constant 0 : index
      %c0_44 = arith.constant 0 : index
      %81 = vector.load %arg8[%c0_43, %c0_44] : memref<16x2xf32, #tpu.memory_space<vmem>>, vector<16x2xf32>
      %cst_45 = arith.constant 1.000000e-30 : f32
      %82 = vector.broadcast %cst_45 : f32 to vector<16x2xf32>
      %83 = arith.maximumf %81, %82 : vector<16x2xf32>
      %cst_46 = arith.constant 1.000000e+00 : f32
      %84 = vector.broadcast %cst_46 : f32 to vector<16x2xf32>
      %85 = arith.divf %84, %83 : vector<16x2xf32>
      %c0_47 = arith.constant 0 : index
      %c0_48 = arith.constant 0 : index
      %86 = vector.load %arg9[%c0_47, %c0_48] : memref<16x16xf32, #tpu.memory_space<vmem>>, vector<16x8xf32>
      %87 = vector.extract_strided_slice %85 {offsets = [0, 0], sizes = [16, 1], strides = [1, 1]} : vector<16x2xf32> to vector<16x1xf32>
      %88 = vector.broadcast %87 : vector<16x1xf32> to vector<16x8xf32>
      %89 = arith.mulf %86, %88 : vector<16x8xf32>
      %c0_49 = arith.constant 0 : index
      %c0_50 = arith.constant 0 : index
      %90 = vector.load %arg9[%c0_49, %c0_50] : memref<16x16xf32, #tpu.memory_space<vmem>>, vector<16x8xf32>
      tpu.vector_store %arg9[%c0_49, %c0_50], %89 {strides = array<i32>} : memref<16x16xf32, #tpu.memory_space<vmem>>, vector<16x8xf32>,
      %c0_51 = arith.constant 0 : index
      %c8_52 = arith.constant 8 : index
      %91 = vector.load %arg9[%c0_51, %c8_52] : memref<16x16xf32, #tpu.memory_space<vmem>>, vector<16x8xf32>
      %92 = vector.extract_strided_slice %85 {offsets = [0, 1], sizes = [16, 1], strides = [1, 1]} : vector<16x2xf32> to vector<16x1xf32>
      %93 = vector.broadcast %92 : vector<16x1xf32> to vector<16x8xf32>
      %94 = arith.mulf %91, %93 : vector<16x8xf32>
      %c0_53 = arith.constant 0 : index
      %c8_54 = arith.constant 8 : index
      %95 = vector.load %arg9[%c0_53, %c8_54] : memref<16x16xf32, #tpu.memory_space<vmem>>, vector<16x8xf32>
      tpu.vector_store %arg9[%c0_53, %c8_54], %94 {strides = array<i32>} : memref<16x16xf32, #tpu.memory_space<vmem>>, vector<16x8xf32>,
      %c0_55 = arith.constant 0 : index
      %c0_56 = arith.constant 0 : index
      %96 = vector.load %arg9[%c0_55, %c0_56] : memref<16x16xf32, #tpu.memory_space<vmem>>, vector<16x16xf32>
      %cst_57 = arith.constant 0.000000e+00 : f32
      %97 = vector.broadcast %cst_57 : f32 to vector<16x16xf32>
      %98 = arith.cmpf ogt, %96, %97 : vector<16x16xf32>
      %cst_58 = arith.constant 0.000000e+00 : f32
      %99 = vector.broadcast %cst_58 : f32 to vector<16x16xf32>
      %100 = arith.minimumf %96, %99 : vector<16x16xf32>
      %101 = math.exp %100 : vector<16x16xf32>
      %cst_59 = arith.constant 1.000000e+00 : f32
      %102 = vector.broadcast %cst_59 : f32 to vector<16x16xf32>
      %103 = arith.subf %101, %102 : vector<16x16xf32>
      %104 = arith.select %98, %96, %103 : vector<16x16xi1>, vector<16x16xf32>
      %105 = arith.truncf %104 : vector<16x16xf32> to vector<16x16xbf16>
      %c0_60 = arith.constant 0 : index
      %c0_61 = arith.constant 0 : index
      %106 = vector.load %arg6[%c0_60, %c0_61] : memref<16x16xbf16, #tpu.memory_space<vmem>>, vector<16x16xbf16>
      tpu.vector_store %arg6[%c0_60, %c0_61], %105 {strides = array<i32>} : memref<16x16xbf16, #tpu.memory_space<vmem>>, vector<16x16xbf16>,
    } else {
    }
    return
  }
  func.func @transform_0(%arg0: i32, %arg1: i32) -> (i32, i32) {
    %c0_i32 = arith.constant 0 : i32
    %c0_i32_0 = arith.constant 0 : i32
    return %arg1, %c0_i32 : i32, i32
  }
  func.func @transform_1(%arg0: i32, %arg1: i32) -> (i32, i32) {
    %c0_i32 = arith.constant 0 : i32
    %c0_i32_0 = arith.constant 0 : i32
    return %c0_i32, %arg1 : i32, i32
  }
  func.func @transform_2(%arg0: i32, %arg1: i32) -> (i32, i32) {
    %c0_i32 = arith.constant 0 : i32
    %c0_i32_0 = arith.constant 0 : i32
    return %arg0, %c0_i32 : i32, i32
  }
  func.func @transform_3(%arg0: i32, %arg1: i32) -> (i32, i32) {
    %c0_i32 = arith.constant 0 : i32
    return %arg0, %arg1 : i32, i32
  }
  func.func @transform_4(%arg0: i32, %arg1: i32) -> (i32, i32) {
    %c0_i32 = arith.constant 0 : i32
    %c0_i32_0 = arith.constant 0 : i32
    return %arg0, %c0_i32 : i32, i32
  }
}

module attributes {stable_mosaic.version = 11 : i64} {
  func.func @_proj_kernel(%arg0: i32, %arg1: memref<16x16xbf16, #tpu.memory_space<vmem>>, %arg2: memref<16x6xbf16, #tpu.memory_space<vmem>>, %arg3: memref<16x6xf32, #tpu.memory_space<vmem>>) attributes {dimension_semantics = [#tpu.dimension_semantics<parallel>], iteration_bounds = array<i64: 1>, scalar_prefetch = 0 : i64, scratch_operands = 0 : i64, tpu.core_type = #tpu.core_type<tc>, window_params = [{transform_indices = @transform_0, window_bounds = array<i64: 16, 16>}, {pipeline_mode = #tpu.pipeline_mode<synchronous>, transform_indices = @transform_1, window_bounds = array<i64: 16, 6>}, {transform_indices = @transform_2, window_bounds = array<i64: 16, 6>}]} {
    %c0 = arith.constant 0 : index
    %c0_0 = arith.constant 0 : index
    %0 = vector.load %arg1[%c0, %c0_0] : memref<16x16xbf16, #tpu.memory_space<vmem>>, vector<16x16xbf16>
    %c0_1 = arith.constant 0 : index
    %c0_2 = arith.constant 0 : index
    %1 = vector.load %arg2[%c0_1, %c0_2] : memref<16x6xbf16, #tpu.memory_space<vmem>>, vector<16x6xbf16>
    %cst = arith.constant dense<0.000000e+00> : vector<16x6xf32>
    %2 = tpu.matmul %0, %1, %cst {dimension_numbers = #tpu.dot_dimension_numbers<[1], [0], [0], [1], [0, 0, 1, 1], [], []>} : vector<16x16xbf16>, vector<16x6xbf16>, vector<16x6xf32> -> vector<16x6xf32>
    %c0_3 = arith.constant 0 : index
    %c0_4 = arith.constant 0 : index
    %3 = vector.load %arg3[%c0_3, %c0_4] : memref<16x6xf32, #tpu.memory_space<vmem>>, vector<16x6xf32>
    tpu.vector_store %arg3[%c0_3, %c0_4], %2 {strides = array<i32>} : memref<16x6xf32, #tpu.memory_space<vmem>>, vector<16x6xf32>,
    return
  }
  func.func @transform_0(%arg0: i32) -> (i32, i32) {
    %c0_i32 = arith.constant 0 : i32
    %c0_i32_0 = arith.constant 0 : i32
    return %arg0, %c0_i32 : i32, i32
  }
  func.func @transform_1(%arg0: i32) -> (i32, i32) {
    %c0_i32 = arith.constant 0 : i32
    %c0_i32_0 = arith.constant 0 : i32
    %c0_i32_1 = arith.constant 0 : i32
    return %c0_i32, %c0_i32_0 : i32, i32
  }
  func.func @transform_2(%arg0: i32) -> (i32, i32) {
    %c0_i32 = arith.constant 0 : i32
    %c0_i32_0 = arith.constant 0 : i32
    return %arg0, %c0_i32 : i32, i32
  }
}

module attributes {stable_mosaic.version = 11 : i64} {
  func.func @_gat_attn_kernel(%arg0: i32, %arg1: i32, %arg2: memref<16x4xbf16, #tpu.memory_space<vmem>>, %arg3: memref<1x16xf32, #tpu.memory_space<vmem>>, %arg4: memref<16x1xf32, #tpu.memory_space<vmem>>, %arg5: memref<16x16xi8, #tpu.memory_space<vmem>>, %arg6: memref<16x4xf32, #tpu.memory_space<vmem>>, %arg7: memref<16x1xf32, #tpu.memory_space<vmem>>, %arg8: memref<16x1xf32, #tpu.memory_space<vmem>>, %arg9: memref<16x4xf32, #tpu.memory_space<vmem>>) attributes {dimension_semantics = [#tpu.dimension_semantics<parallel>, #tpu.dimension_semantics<arbitrary>], iteration_bounds = array<i64: 1, 1>, scalar_prefetch = 0 : i64, scratch_operands = 3 : i64, tpu.core_type = #tpu.core_type<tc>, window_params = [{transform_indices = @transform_0, window_bounds = array<i64: 16, 4>}, {transform_indices = @transform_1, window_bounds = array<i64: 1, 16>}, {transform_indices = @transform_2, window_bounds = array<i64: 16, 1>}, {transform_indices = @transform_3, window_bounds = array<i64: 16, 16>}, {transform_indices = @transform_4, window_bounds = array<i64: 16, 4>}]} {
    %c0_i32 = arith.constant 0 : i32
    %0 = arith.cmpi eq, %arg1, %c0_i32 : i32
    %1 = arith.extui %0 : i1 to i32
    %c0_i32_0 = arith.constant 0 : i32
    %2 = arith.cmpi ne, %1, %c0_i32_0 : i32
    scf.if %2 {
      %cst_26 = arith.constant -1.000000e+30 : f32
      %44 = vector.broadcast %cst_26 : f32 to vector<16x1xf32>
      %c0_27 = arith.constant 0 : index
      %c0_28 = arith.constant 0 : index
      %45 = vector.load %arg7[%c0_27, %c0_28] : memref<16x1xf32, #tpu.memory_space<vmem>>, vector<16x1xf32>
      tpu.vector_store %arg7[%c0_27, %c0_28], %44 {strides = array<i32>} : memref<16x1xf32, #tpu.memory_space<vmem>>, vector<16x1xf32>,
      %cst_29 = arith.constant 0.000000e+00 : f32
      %46 = vector.broadcast %cst_29 : f32 to vector<16x1xf32>
      %c0_30 = arith.constant 0 : index
      %c0_31 = arith.constant 0 : index
      %47 = vector.load %arg8[%c0_30, %c0_31] : memref<16x1xf32, #tpu.memory_space<vmem>>, vector<16x1xf32>
      tpu.vector_store %arg8[%c0_30, %c0_31], %46 {strides = array<i32>} : memref<16x1xf32, #tpu.memory_space<vmem>>, vector<16x1xf32>,
      %cst_32 = arith.constant 0.000000e+00 : f32
      %48 = vector.broadcast %cst_32 : f32 to vector<16x4xf32>
      %c0_33 = arith.constant 0 : index
      %c0_34 = arith.constant 0 : index
      %49 = vector.load %arg9[%c0_33, %c0_34] : memref<16x4xf32, #tpu.memory_space<vmem>>, vector<16x4xf32>
      tpu.vector_store %arg9[%c0_33, %c0_34], %48 {strides = array<i32>} : memref<16x4xf32, #tpu.memory_space<vmem>>, vector<16x4xf32>,
    } else {
    }
    %c0 = arith.constant 0 : index
    %c0_1 = arith.constant 0 : index
    %3 = vector.load %arg5[%c0, %c0_1] : memref<16x16xi8, #tpu.memory_space<vmem>>, vector<16x16xi8>
    %c0_i8 = arith.constant 0 : i8
    %4 = vector.broadcast %c0_i8 : i8 to vector<16x16xi8>
    %5 = arith.cmpi ne, %3, %4 : vector<16x16xi8>
    %c0_2 = arith.constant 0 : index
    %c0_3 = arith.constant 0 : index
    %6 = vector.load %arg4[%c0_2, %c0_3] : memref<16x1xf32, #tpu.memory_space<vmem>>, vector<16x1xf32>
    %c0_4 = arith.constant 0 : index
    %c0_5 = arith.constant 0 : index
    %7 = vector.load %arg2[%c0_4, %c0_5] : memref<16x4xbf16, #tpu.memory_space<vmem>>, vector<16x4xbf16>
    %c0_6 = arith.constant 0 : index
    %c0_7 = arith.constant 0 : index
    %8 = vector.load %arg3[%c0_6, %c0_7] : memref<1x16xf32, #tpu.memory_space<vmem>>, vector<1x16xf32>
    %9 = vector.broadcast %6 : vector<16x1xf32> to vector<16x16xf32>
    %10 = vector.broadcast %8 : vector<1x16xf32> to vector<16x16xf32>
    %11 = arith.addf %9, %10 : vector<16x16xf32>
    %cst = arith.constant 0.00999999977 : f32
    %12 = vector.broadcast %cst : f32 to vector<16x16xf32>
    %13 = arith.mulf %12, %11 : vector<16x16xf32>
    %14 = arith.maximumf %11, %13 : vector<16x16xf32>
    %cst_8 = arith.constant -1.000000e+30 : f32
    %15 = vector.broadcast %cst_8 : f32 to vector<16x16xf32>
    %16 = arith.select %5, %14, %15 : vector<16x16xi1>, vector<16x16xf32>
    %c0_9 = arith.constant 0 : index
    %c0_10 = arith.constant 0 : index
    %17 = vector.load %arg7[%c0_9, %c0_10] : memref<16x1xf32, #tpu.memory_space<vmem>>, vector<16x1xf32>
    %cst_11 = arith.constant dense<0xFF800000> : vector<16xf32>
    %18 = vector.multi_reduction <maximumf>, %16, %cst_11 [1] : vector<16x16xf32> to vector<16xf32>
    %19 = vector.shape_cast %18 : vector<16xf32> to vector<16x1xf32>
    %20 = arith.maximumf %17, %19 : vector<16x1xf32>
    %21 = arith.subf %17, %20 : vector<16x1xf32>
    %22 = math.exp %21 : vector<16x1xf32>
    %23 = vector.broadcast %20 : vector<16x1xf32> to vector<16x16xf32>
    %24 = arith.subf %16, %23 : vector<16x16xf32>
    %25 = arith.truncf %24 : vector<16x16xf32> to vector<16x16xbf16>
    %26 = math.exp %25 : vector<16x16xbf16>
    %27 = arith.extf %26 : vector<16x16xbf16> to vector<16x16xf32>
    %cst_12 = arith.constant dense<0.000000e+00> : vector<16xf32>
    %28 = vector.multi_reduction <add>, %27, %cst_12 [1] : vector<16x16xf32> to vector<16xf32>
    %29 = vector.shape_cast %28 : vector<16xf32> to vector<16x1xf32>
    %c0_13 = arith.constant 0 : index
    %c0_14 = arith.constant 0 : index
    %30 = vector.load %arg8[%c0_13, %c0_14] : memref<16x1xf32, #tpu.memory_space<vmem>>, vector<16x1xf32>
    %31 = arith.mulf %22, %30 : vector<16x1xf32>
    %32 = arith.addf %31, %29 : vector<16x1xf32>
    %c0_15 = arith.constant 0 : index
    %c0_16 = arith.constant 0 : index
    %33 = vector.load %arg8[%c0_15, %c0_16] : memref<16x1xf32, #tpu.memory_space<vmem>>, vector<16x1xf32>
    tpu.vector_store %arg8[%c0_15, %c0_16], %32 {strides = array<i32>} : memref<16x1xf32, #tpu.memory_space<vmem>>, vector<16x1xf32>,
    %c0_17 = arith.constant 0 : index
    %c0_18 = arith.constant 0 : index
    %34 = vector.load %arg9[%c0_17, %c0_18] : memref<16x4xf32, #tpu.memory_space<vmem>>, vector<16x4xf32>
    %35 = vector.broadcast %22 : vector<16x1xf32> to vector<16x4xf32>
    %36 = arith.mulf %35, %34 : vector<16x4xf32>
    %cst_19 = arith.constant dense<0.000000e+00> : vector<16x4xf32>
    %37 = tpu.matmul %26, %7, %cst_19 {dimension_numbers = #tpu.dot_dimension_numbers<[1], [0], [0], [1], [0, 0, 1, 1], [], []>} : vector<16x16xbf16>, vector<16x4xbf16>, vector<16x4xf32> -> vector<16x4xf32>
    %38 = arith.addf %36, %37 : vector<16x4xf32>
    %c0_20 = arith.constant 0 : index
    %c0_21 = arith.constant 0 : index
    %39 = vector.load %arg9[%c0_20, %c0_21] : memref<16x4xf32, #tpu.memory_space<vmem>>, vector<16x4xf32>
    tpu.vector_store %arg9[%c0_20, %c0_21], %38 {strides = array<i32>} : memref<16x4xf32, #tpu.memory_space<vmem>>, vector<16x4xf32>,
    %c0_22 = arith.constant 0 : index
    %c0_23 = arith.constant 0 : index
    %40 = vector.load %arg7[%c0_22, %c0_23] : memref<16x1xf32, #tpu.memory_space<vmem>>, vector<16x1xf32>
    tpu.vector_store %arg7[%c0_22, %c0_23], %20 {strides = array<i32>} : memref<16x1xf32, #tpu.memory_space<vmem>>, vector<16x1xf32>,
    %c0_i32_24 = arith.constant 0 : i32
    %41 = arith.cmpi eq, %arg1, %c0_i32_24 : i32
    %42 = arith.extui %41 : i1 to i32
    %c0_i32_25 = arith.constant 0 : i32
    %43 = arith.cmpi ne, %42, %c0_i32_25 : i32
    scf.if %43 {
      %c0_26 = arith.constant 0 : index
      %c0_27 = arith.constant 0 : index
      %44 = vector.load %arg8[%c0_26, %c0_27] : memref<16x1xf32, #tpu.memory_space<vmem>>, vector<16x1xf32>
      %cst_28 = arith.constant 1.000000e-30 : f32
      %45 = vector.broadcast %cst_28 : f32 to vector<16x1xf32>
      %46 = arith.maximumf %44, %45 : vector<16x1xf32>
      %cst_29 = arith.constant 1.000000e+00 : f32
      %47 = vector.broadcast %cst_29 : f32 to vector<16x1xf32>
      %48 = arith.divf %47, %46 : vector<16x1xf32>
      %c0_30 = arith.constant 0 : index
      %c0_31 = arith.constant 0 : index
      %49 = vector.load %arg9[%c0_30, %c0_31] : memref<16x4xf32, #tpu.memory_space<vmem>>, vector<16x4xf32>
      %50 = vector.broadcast %48 : vector<16x1xf32> to vector<16x4xf32>
      %51 = arith.mulf %49, %50 : vector<16x4xf32>
      %c0_32 = arith.constant 0 : index
      %c0_33 = arith.constant 0 : index
      %52 = vector.load %arg9[%c0_32, %c0_33] : memref<16x4xf32, #tpu.memory_space<vmem>>, vector<16x4xf32>
      tpu.vector_store %arg9[%c0_32, %c0_33], %51 {strides = array<i32>} : memref<16x4xf32, #tpu.memory_space<vmem>>, vector<16x4xf32>,
      %c0_34 = arith.constant 0 : index
      %c0_35 = arith.constant 0 : index
      %53 = vector.load %arg9[%c0_34, %c0_35] : memref<16x4xf32, #tpu.memory_space<vmem>>, vector<16x4xf32>
      %c0_36 = arith.constant 0 : index
      %c0_37 = arith.constant 0 : index
      %54 = vector.load %arg6[%c0_36, %c0_37] : memref<16x4xf32, #tpu.memory_space<vmem>>, vector<16x4xf32>
      tpu.vector_store %arg6[%c0_36, %c0_37], %53 {strides = array<i32>} : memref<16x4xf32, #tpu.memory_space<vmem>>, vector<16x4xf32>,
    } else {
    }
    return
  }
  func.func @transform_0(%arg0: i32, %arg1: i32) -> (i32, i32) {
    %c0_i32 = arith.constant 0 : i32
    %c0_i32_0 = arith.constant 0 : i32
    return %arg1, %c0_i32 : i32, i32
  }
  func.func @transform_1(%arg0: i32, %arg1: i32) -> (i32, i32) {
    %c0_i32 = arith.constant 0 : i32
    %c0_i32_0 = arith.constant 0 : i32
    return %c0_i32, %arg1 : i32, i32
  }
  func.func @transform_2(%arg0: i32, %arg1: i32) -> (i32, i32) {
    %c0_i32 = arith.constant 0 : i32
    %c0_i32_0 = arith.constant 0 : i32
    return %arg0, %c0_i32 : i32, i32
  }
  func.func @transform_3(%arg0: i32, %arg1: i32) -> (i32, i32) {
    %c0_i32 = arith.constant 0 : i32
    return %arg0, %arg1 : i32, i32
  }
  func.func @transform_4(%arg0: i32, %arg1: i32) -> (i32, i32) {
    %c0_i32 = arith.constant 0 : i32
    %c0_i32_0 = arith.constant 0 : i32
    return %arg0, %c0_i32 : i32, i32
  }
}

</mosaic_0001>

<bundles_post_ra>
// kernel: gat_forward.6
= control target key start
LH: loop header
LB: loop body
LE: loop exit
PB: predicated region body
PF: predicated region fallthrough
CT: control target
= control target key end

     0   :  { %7 = vsyncpa [#allocation3], 0  ;;  %s276_s0 = inlined_call_operand.hbm [shape: bf16[16,16], index: 0, kind: input, shape index: {}]   ;;  %s277_s1 = inlined_call_operand.hbm [shape: bf16[16,6], index: 1, kind: input, shape index: {}]   ;;  %s278_s2 = inlined_call_operand.hbm [shape: f32[16,6], index: 2, kind: output, shape index: {}]  }
   0x1   :  { %8 = vsyncpa [#allocation6], 0 }
   0x2   :  { %9 = vsyncpa [#allocation4], 0  ;;  %s216_s9 = smov [#allocation2]   ;;  %s144_s13 = scalar_lea.hbm %s276_s0, 128 }
   0x3   :  { %s15_s10 = sshll.u32 %s216_s9, 4  ;;  %p145_p0 = scmp.ne.s32.totalorder %s276_s0, %s144_s13  ;;  %s16_s10 = int_to_ptr.vmem [resolvable:$true] %s15_s10 }
   0x4   :  { %p148_p1 = scmp.lt.u32.totalorder %s144_s13, %s276_s0 }
   0x6   :  { %p150_p2 = pnand %p148_p1, %p145_p0 }
   0x8   :  { %153 = shalt.err (!%p150_p2)
}
   0x9   :  { %s154_s18 = scalar_lea.vmem %s16_s10, 128  ;;  %p159_p4 = scmp.lt.s32.totalorder %s16_s10, %s16_s10 }
   0xa   :  { %p155_p3 = scmp.ne.s32.totalorder %s16_s10, %s154_s18  ;;  %p160_p5 = scmp.lt.s32.totalorder %s154_s18, %s154_s18 }
   0xc   :  { %p161_p6 = por %p160_p5, %p159_p4 }
   0xe   :  { %p162_p7 = pnand %p161_p6, %p155_p3 }
  0x10   :  { %165 = shalt.err (!%p162_p7)
}
  0x11   :  { %s217_s19 = smov 64   ;;  %s218_s20 = smov 4  }
  0x12   :  { %21 = dma.hbm_to_vmem [thread:$0]  %s276_s0, 128, %s16_s10, [#allocation3], %s217_s19, %s217_s19, %s218_s20  }
  0x13   :  { %s219_s23 = smov [#allocation5]   ;;  %s166_s27 = scalar_lea.hbm %s277_s1, 128 }
  0x14   :  { %s27_s24 = sshll.u32 %s219_s23, 4  ;;  %p167_p8 = scmp.ne.s32.totalorder %s277_s1, %s166_s27  ;;  %s28_s24 = int_to_ptr.vmem [resolvable:$true] %s27_s24 }
  0x15   :  { %p170_p9 = scmp.lt.u32.totalorder %s166_s27, %s277_s1 }
  0x17   :  { %p172_p10 = pnand %p170_p9, %p167_p8 }
  0x19   :  { %175 = shalt.err (!%p172_p10)
}
  0x1a   :  { %s176_s4 = scalar_lea.vmem %s28_s24, 128  ;;  %p181_p12 = scmp.lt.s32.totalorder %s28_s24, %s28_s24 }
  0x1b   :  { %p177_p11 = scmp.ne.s32.totalorder %s28_s24, %s176_s4  ;;  %p182_p13 = scmp.lt.s32.totalorder %s176_s4, %s176_s4 }
  0x1d   :  { %p183_p0 = por %p182_p13, %p181_p12 }
  0x1f   :  { %p184_p1 = pnand %p183_p0, %p177_p11 }
  0x21   :  { %187 = shalt.err (!%p184_p1)
}
  0x22   :  { %33 = dma.hbm_to_vmem [thread:$0]  %s277_s1, 128, %s28_s24, [#allocation6], %s217_s19, %s217_s19, %s218_s20  }
  0x23   :  { %210 = dma.done.wait [#allocation3], 128  }
  0x24   :  { %211 = vsyncadd [#allocation3], 4294967168 }
  0x25   :  { %212 = dma.done.wait [#allocation6], 128  }
  0x26   :  { %213 = vsyncadd [#allocation6], 4294967168  ;;  %v220_v0 = vmov 0.0   ;;  %vm221_vm0 = vmmov 0   ;;  %v142_v1 = vld [vmem:[#allocation5] sm:$0xff]   ;;  %v143_v2 = vld [vmem:[#allocation2] sm:$0xff]  }
  0x27   :  { %127 = vmatprep.subr.bf16.mxu0 %v220_v0  ;;  %129 = vmatprep.mubr.msk.bf16.mxu0 %vm221_vm0, %v220_v0  ;;  %vm56_vm1 = vcmask 130048   ;;  %s222_s6 = smov [#allocation7]   ;;  %vm101_vm2 = vcmask 48128  }
  0x28   :  { %128 = vmatpush3.bf16.msra.mxu0 %v142_v1  ;;  %s109_s7 = sshll.u32 %s222_s6, 4  ;;  %s110_s7 = int_to_ptr.vmem [resolvable:$true] %s109_s7 }
  0x29   :  { %s188_s1 = scalar_lea.vmem %s110_s7, 256  ;;  %p193_p3 = scmp.lt.s32.totalorder %s110_s7, %s110_s7 }
  0x2a   :  { %p189_p2 = scmp.ne.s32.totalorder %s110_s7, %s188_s1  ;;  %p194_p4 = scmp.lt.s32.totalorder %s188_s1, %s188_s1 }
  0x2b   :  { %130 = vmatmul.mubr.msk.bf16.vlgmr.msra.gmra.mrb[0].mxu0 %vm56_vm1, %v143_v2 }
  0x2c   :  { %p195_p5 = por %p194_p4, %p193_p3 }
  0x2e   :  { %p196_p6 = pnand %p195_p5, %p189_p2 }
  0xfe   :  { %v94_v3 = vpop.f32.mrb[0].mxu0 }
  0xff   :  { %102 = vst.msk [vmem:[#allocation7] sm:$0xff] %vm101_vm2, %v94_v3  ;;  %v131_v4 = vpop.f32.mrb[1].mxu0 }
 0x100   :  { %v97_v5 = vpop.f32.mrb[2].mxu0 }
 0x101   :  { %103 = vst.msk [vmem:[#allocation7 + $0x8] sm:$0xff] %vm101_vm2, %v97_v5  ;;  %v132_v6 = vpop.f32.mrb[3].mxu0 }
 0x102   :  { %199 = shalt.err (!%p196_p6)
}
 0x103   :  { %s200_s10 = scalar_lea.hbm %s278_s2, 256 }
 0x104   :  { %p201_p7 = scmp.ne.s32.totalorder %s278_s2, %s200_s10  ;;  %p204_p8 = scmp.lt.u32.totalorder %s200_s10, %s278_s2 }
 0x106   :  { %p206_p9 = pnand %p204_p8, %p201_p7 }
 0x108   :  { %209 = shalt.err (!%p206_p9)
}
 0x109   :  { %s223_s15 = smov 128   ;;  %s224_s16 = smov 8  }
 0x10a   :  { %115 = dma.vmem_to_hbm [thread:$0]  %s110_s7, 256, %s278_s2, [#allocation4], %s223_s15, %s223_s15, %s224_s16  }
 0x10b   :  { %214 = dma.done.wait [#allocation4], 256  }
 0x10c   :  { %215 = vsyncadd [#allocation4], 4294967040 }
 0x10d   :  { %119 = vsyncpa [#allocation3], 1 }
 0x10e   :  { %120 = vsyncpa [#allocation6], 1 }
 0x10f   :  { %121 = vsyncpa [#allocation4], 1 }

// kernel: gat_forward.4
= control target key start
LH: loop header
LB: loop body
LE: loop exit
PB: predicated region body
PF: predicated region fallthrough
CT: control target
= control target key end

     0   :  { %7 = vsyncpa [#allocation3], 0  ;;  %s276_s0 = inlined_call_operand.hbm [shape: bf16[16,16], index: 0, kind: input, shape index: {}]   ;;  %s277_s1 = inlined_call_operand.hbm [shape: bf16[16,20], index: 1, kind: input, shape index: {}]   ;;  %s278_s2 = inlined_call_operand.hbm [shape: f32[16,20], index: 2, kind: output, shape index: {}]  }
   0x1   :  { %8 = vsyncpa [#allocation6], 0 }
   0x2   :  { %9 = vsyncpa [#allocation4], 0  ;;  %s216_s9 = smov [#allocation2]   ;;  %s144_s13 = scalar_lea.hbm %s276_s0, 128 }
   0x3   :  { %s15_s10 = sshll.u32 %s216_s9, 4  ;;  %p145_p0 = scmp.ne.s32.totalorder %s276_s0, %s144_s13  ;;  %s16_s10 = int_to_ptr.vmem [resolvable:$true] %s15_s10 }
   0x4   :  { %p148_p1 = scmp.lt.u32.totalorder %s144_s13, %s276_s0 }
   0x6   :  { %p150_p2 = pnand %p148_p1, %p145_p0 }
   0x8   :  { %153 = shalt.err (!%p150_p2)
}
   0x9   :  { %s154_s18 = scalar_lea.vmem %s16_s10, 128  ;;  %p159_p4 = scmp.lt.s32.totalorder %s16_s10, %s16_s10 }
   0xa   :  { %p155_p3 = scmp.ne.s32.totalorder %s16_s10, %s154_s18  ;;  %p160_p5 = scmp.lt.s32.totalorder %s154_s18, %s154_s18 }
   0xc   :  { %p161_p6 = por %p160_p5, %p159_p4 }
   0xe   :  { %p162_p7 = pnand %p161_p6, %p155_p3 }
  0x10   :  { %165 = shalt.err (!%p162_p7)
}
  0x11   :  { %s217_s19 = smov 64   ;;  %s218_s20 = smov 4  }
  0x12   :  { %21 = dma.hbm_to_vmem [thread:$0]  %s276_s0, 128, %s16_s10, [#allocation3], %s217_s19, %s217_s19, %s218_s20  }
  0x13   :  { %s219_s23 = smov [#allocation5]   ;;  %s166_s27 = scalar_lea.hbm %s277_s1, 128 }
  0x14   :  { %s27_s24 = sshll.u32 %s219_s23, 4  ;;  %p167_p8 = scmp.ne.s32.totalorder %s277_s1, %s166_s27  ;;  %s28_s24 = int_to_ptr.vmem [resolvable:$true] %s27_s24 }
  0x15   :  { %p170_p9 = scmp.lt.u32.totalorder %s166_s27, %s277_s1 }
  0x17   :  { %p172_p10 = pnand %p170_p9, %p167_p8 }
  0x19   :  { %175 = shalt.err (!%p172_p10)
}
  0x1a   :  { %s176_s4 = scalar_lea.vmem %s28_s24, 128  ;;  %p181_p12 = scmp.lt.s32.totalorder %s28_s24, %s28_s24 }
  0x1b   :  { %p177_p11 = scmp.ne.s32.totalorder %s28_s24, %s176_s4  ;;  %p182_p13 = scmp.lt.s32.totalorder %s176_s4, %s176_s4 }
  0x1d   :  { %p183_p0 = por %p182_p13, %p181_p12 }
  0x1f   :  { %p184_p1 = pnand %p183_p0, %p177_p11 }
  0x21   :  { %187 = shalt.err (!%p184_p1)
}
  0x22   :  { %33 = dma.hbm_to_vmem [thread:$0]  %s277_s1, 128, %s28_s24, [#allocation6], %s217_s19, %s217_s19, %s218_s20  }
  0x23   :  { %210 = dma.done.wait [#allocation3], 128  }
  0x24   :  { %211 = vsyncadd [#allocation3], 4294967168 }
  0x25   :  { %212 = dma.done.wait [#allocation6], 128  }
  0x26   :  { %213 = vsyncadd [#allocation6], 4294967168  ;;  %v220_v0 = vmov 0.0   ;;  %vm221_vm0 = vmmov 0   ;;  %v142_v1 = vld [vmem:[#allocation5] sm:$0xff]   ;;  %v143_v2 = vld [vmem:[#allocation2] sm:$0xff]  }
  0x27   :  { %127 = vmatprep.subr.bf16.mxu0 %v220_v0  ;;  %129 = vmatprep.mubr.msk.bf16.mxu0 %vm221_vm0, %v220_v0  ;;  %vm56_vm1 = vcmask 130048   ;;  %s222_s6 = smov [#allocation7]   ;;  %vm101_vm2 = vcmask 162816  }
  0x28   :  { %128 = vmatpush3.bf16.msra.mxu0 %v142_v1  ;;  %s109_s7 = sshll.u32 %s222_s6, 4  ;;  %s110_s7 = int_to_ptr.vmem [resolvable:$true] %s109_s7 }
  0x29   :  { %s188_s1 = scalar_lea.vmem %s110_s7, 256  ;;  %p193_p3 = scmp.lt.s32.totalorder %s110_s7, %s110_s7 }
  0x2a   :  { %p189_p2 = scmp.ne.s32.totalorder %s110_s7, %s188_s1  ;;  %p194_p4 = scmp.lt.s32.totalorder %s188_s1, %s188_s1 }
  0x2b   :  { %130 = vmatmul.mubr.msk.bf16.vlgmr.msra.gmra.mrb[0].mxu0 %vm56_vm1, %v143_v2 }
  0x2c   :  { %p195_p5 = por %p194_p4, %p193_p3 }
  0x2e   :  { %p196_p6 = pnand %p195_p5, %p189_p2 }
  0xfe   :  { %v94_v3 = vpop.f32.mrb[0].mxu0 }
  0xff   :  { %102 = vst.msk [vmem:[#allocation7] sm:$0xff] %vm101_vm2, %v94_v3  ;;  %v131_v4 = vpop.f32.mrb[1].mxu0 }
 0x100   :  { %v97_v5 = vpop.f32.mrb[2].mxu0 }
 0x101   :  { %103 = vst.msk [vmem:[#allocation7 + $0x8] sm:$0xff] %vm101_vm2, %v97_v5  ;;  %v132_v6 = vpop.f32.mrb[3].mxu0 }
 0x102   :  { %199 = shalt.err (!%p196_p6)
}
 0x103   :  { %s200_s10 = scalar_lea.hbm %s278_s2, 256 }
 0x104   :  { %p201_p7 = scmp.ne.s32.totalorder %s278_s2, %s200_s10  ;;  %p204_p8 = scmp.lt.u32.totalorder %s200_s10, %s278_s2 }
 0x106   :  { %p206_p9 = pnand %p204_p8, %p201_p7 }
 0x108   :  { %209 = shalt.err (!%p206_p9)
}
 0x109   :  { %s223_s15 = smov 128   ;;  %s224_s16 = smov 8  }
 0x10a   :  { %115 = dma.vmem_to_hbm [thread:$0]  %s110_s7, 256, %s278_s2, [#allocation4], %s223_s15, %s223_s15, %s224_s16  }
 0x10b   :  { %214 = dma.done.wait [#allocation4], 256  }
 0x10c   :  { %215 = vsyncadd [#allocation4], 4294967040 }
 0x10d   :  { %119 = vsyncpa [#allocation3], 1 }
 0x10e   :  { %120 = vsyncpa [#allocation6], 1 }
 0x10f   :  { %121 = vsyncpa [#allocation4], 1 }

// kernel: gat_forward.5
= control target key start
LH: loop header
LB: loop body
LE: loop exit
PB: predicated region body
PF: predicated region fallthrough
CT: control target
= control target key end

     0   :  { %9 = vsyncpa [#allocation6], 0  ;;  %s845_s0 = inlined_call_operand.hbm [shape: bf16[16,16], index: 0, kind: input, shape index: {}]   ;;  %s846_s1 = inlined_call_operand.hbm [shape: f32[2,16], index: 1, kind: input, shape index: {}]   ;;  %s847_s2 = inlined_call_operand.hbm [shape: f32[16,2], index: 2, kind: input, shape index: {}]   ;;  %s848_s3 = inlined_call_operand.hbm [shape: s8[16,16], index: 3, kind: input, shape index: {}]   ;;  %s849_s4 = inlined_call_operand.hbm [shape: bf16[16,16], index: 4, kind: output, shape index: {}]  }
   0x1   :  { %10 = vsyncpa [#allocation9], 0 }
   0x2   :  { %11 = vsyncpa [#allocation12], 0 }
   0x3   :  { %12 = vsyncpa [#allocation7], 0  ;;  %s667_s15 = smov [#allocation8]   ;;  %s668_s17 = smov [#allocation5]  }
   0x4   :  { %s31_s16 = sshll.u32 %s667_s15, 4  ;;  %s18_s18 = sshll.u32 %s668_s17, 4  ;;  %s32_s16 = int_to_ptr.vmem [resolvable:$true] %s31_s16  ;;  %s709_s18 = int_to_ptr.vmem [resolvable:$true] %s18_s18 }
   0x5   :  { %s549_s21 = scalar_lea.hbm %s846_s1, 32 }
   0x6   :  { %p550_p0 = scmp.ne.s32.totalorder %s846_s1, %s549_s21  ;;  %p553_p1 = scmp.lt.u32.totalorder %s549_s21, %s846_s1 }
   0x8   :  { %p555_p2 = pnand %p553_p1, %p550_p0 }
   0xa   :  { %558 = shalt.err (!%p555_p2)
}
   0xb   :  { %s559_s26 = scalar_lea.vmem %s32_s16, 32  ;;  %p564_p4 = scmp.lt.s32.totalorder %s32_s16, %s32_s16 }
   0xc   :  { %p560_p3 = scmp.ne.s32.totalorder %s32_s16, %s559_s26  ;;  %p565_p5 = scmp.lt.s32.totalorder %s559_s26, %s559_s26 }
   0xe   :  { %p566_p6 = por %p565_p5, %p564_p4 }
  0x10   :  { %p567_p7 = pnand %p566_p6, %p560_p3 }
  0x12   :  { %570 = shalt.err (!%p567_p7)
}
  0x13   :  { %34 = dma.hbm_to_vmem [thread:$0]  %s846_s1, 32, %s32_s16, [#allocation9]  }
  0x14   :  { %s571_s5 = scalar_lea.hbm %s845_s0, 128 }
  0x15   :  { %p572_p8 = scmp.ne.s32.totalorder %s845_s0, %s571_s5  ;;  %p575_p9 = scmp.lt.u32.totalorder %s571_s5, %s845_s0 }
  0x17   :  { %p577_p10 = pnand %p575_p9, %p572_p8 }
  0x19   :  { %580 = shalt.err (!%p577_p10)
}
  0x1a   :  { %s581_s10 = scalar_lea.vmem %s709_s18, 128  ;;  %p586_p12 = scmp.lt.s32.totalorder %s709_s18, %s709_s18 }
  0x1b   :  { %p582_p11 = scmp.ne.s32.totalorder %s709_s18, %s581_s10  ;;  %p587_p13 = scmp.lt.s32.totalorder %s581_s10, %s581_s10 }
  0x1d   :  { %p588_p0 = por %p587_p13, %p586_p12 }
  0x1f   :  { %p589_p1 = pnand %p588_p0, %p582_p11 }
  0x21   :  { %592 = shalt.err (!%p589_p1)
}
  0x22   :  { %s669_s1 = smov 64   ;;  %s670_s11 = smov 4  }
  0x23   :  { %24 = dma.hbm_to_vmem [thread:$0]  %s845_s0, 128, %s709_s18, [#allocation6], %s669_s1, %s669_s1, %s670_s11  }
  0x24   :  { %s671_s14 = smov [#allocation10]   ;;  %s593_s19 = scalar_lea.hbm %s847_s2, 256 }
  0x25   :  { %s40_s15 = sshll.u32 %s671_s14, 4  ;;  %p594_p2 = scmp.ne.s32.totalorder %s847_s2, %s593_s19  ;;  %s41_s15 = int_to_ptr.vmem [resolvable:$true] %s40_s15 }
  0x26   :  { %p597_p3 = scmp.lt.u32.totalorder %s593_s19, %s847_s2 }
  0x28   :  { %p599_p4 = pnand %p597_p3, %p594_p2 }
  0x2a   :  { %602 = shalt.err (!%p599_p4)
}
  0x2b   :  { %s603_s24 = scalar_lea.vmem %s41_s15, 256  ;;  %p608_p6 = scmp.lt.s32.totalorder %s41_s15, %s41_s15 }
  0x2c   :  { %p604_p5 = scmp.ne.s32.totalorder %s41_s15, %s603_s24  ;;  %p609_p7 = scmp.lt.s32.totalorder %s603_s24, %s603_s24 }
  0x2e   :  { %p610_p8 = por %p609_p7, %p608_p6 }
  0x30   :  { %p611_p9 = pnand %p610_p8, %p604_p5 }
  0x32   :  { %614 = shalt.err (!%p611_p9)
}
  0x33   :  { %s672_s0 = smov 128   ;;  %s673_s18 = smov 8  }
  0x34   :  { %46 = dma.hbm_to_vmem [thread:$0]  %s847_s2, 256, %s41_s15, [#allocation9], %s672_s0, %s672_s0, %s673_s18  }
  0x35   :  { %s674_s27 = smov [#allocation11]   ;;  %s615_s5 = scalar_lea.hbm %s848_s3, 64 }
  0x36   :  { %s52_s28 = sshll.u32 %s674_s27, 4  ;;  %p616_p10 = scmp.ne.s32.totalorder %s848_s3, %s615_s5  ;;  %s53_s28 = int_to_ptr.vmem [resolvable:$true] %s52_s28 }
  0x37   :  { %p619_p11 = scmp.lt.u32.totalorder %s615_s5, %s848_s3 }
  0x39   :  { %p621_p12 = pnand %p619_p11, %p616_p10 }
  0x3b   :  { %624 = shalt.err (!%p621_p12)
}
  0x3c   :  { %s625_s10 = scalar_lea.vmem %s53_s28, 64  ;;  %p630_p0 = scmp.lt.s32.totalorder %s53_s28, %s53_s28 }
  0x3d   :  { %p626_p13 = scmp.ne.s32.totalorder %s53_s28, %s625_s10  ;;  %p631_p1 = scmp.lt.s32.totalorder %s625_s10, %s625_s10 }
  0x3f   :  { %p632_p2 = por %p631_p1, %p630_p0 }
  0x41   :  { %p633_p3 = pnand %p632_p2, %p626_p13 }
  0x43   :  { %636 = shalt.err (!%p633_p3)
}
  0x44   :  { %s675_s2 = smov 32   ;;  %s676_s12 = smov 2  }
  0x45   :  { %58 = dma.hbm_to_vmem [thread:$0]  %s848_s3, 64, %s53_s28, [#allocation12], %s675_s2, %s675_s2, %s676_s12  }
  0x46   :  { %659 = dma.done.wait [#allocation6], 128  }
  0x47   :  { %660 = vsyncadd [#allocation6], 4294967168 }
  0x48   :  { %661 = dma.done.wait [#allocation9], 288  }
  0x49   :  { %662 = vsyncadd [#allocation9], 4294967008 }
  0x4a   :  { %663 = dma.done.wait [#allocation12], 64  }
  0x4b   :  { %664 = vsyncadd [#allocation12], 4294967232  ;;  %v677_v0 = vmov 0   ;;  %v678_v1 = vmov 1   ;;  %v90_v2 = vld [vmem:[#allocation10] sm:$0xff]  ;;  %v91_v3 = vld [vmem:[#allocation10 + $0x8] sm:$0xff] }
  0x4c   :  { %519 = vset.pattern.permute.xlu0 %v677_v0  ;;  %520 = vset.pattern.permute.xlu1 %v678_v1  ;;  %vm78_vm0 = vcmask 15360   ;;  %v679_v4 = vmov -1e+30   ;;  %v86_v5 = vld [vmem:[#allocation11] sm:$0x3]  ;;  %vm83_vm3 = vcmask 130048  }
  0x4d   :  { %97 = vperm.xlu0 %519, %v90_v2   ;;  %246 = vperm.xlu1 %520, %v90_v2   ;;  %79 = vst.msk [vmem:[#allocation2] sm:$0xff] %vm78_vm0, %v679_v4  ;;  %80 = vst.msk [vmem:[#allocation2 + $0x8] sm:$0xff] %vm78_vm0, %v679_v4  ;;  %vm88_vm1 = vnez %v86_v5  ;;  %v87_v6 = vld [vmem:[#allocation11 + $0x2] sm:$0x3]  ;;  %v475_v8 = vld [vmem:[#allocation8] ss:$0 sm:$0xff] }
  0x4e   :  { %v115_v7 = vsel %vm88_vm1, 16843009, %v677_v0  ;;  %v478_v9 = vld [vmem:[#allocation8 + $0x1] ss:$0 sm:$0xff]  ;;  %vm89_vm2 = vnez %v87_v6  ;;  %v680_v37 = vmov 0.0   ;;  %v528_v38 = vld [vmem:[#allocation5] sm:$0xff]  }
  0x4f   :  { %v117_v12 = vunpack.c.0.s8 %v115_v7  ;;  %v116_v15 = vsel %vm89_vm2, 16843009, %v677_v0  ;;  %84 = vst.msk [vmem:[#allocation4] sm:$0xff] %vm83_vm3, %v680_v37  ;;  %85 = vst.msk [vmem:[#allocation4 + $0x8] sm:$0xff] %vm83_vm3, %v680_v37  ;;  %496 = vmatprep.subr.bf16.mxu1 %v680_v37  ;;  %490 = vmatprep.subr.bf16.mxu0 %v680_v37  ;;  %vm170_vm6 = vcmask 7168   ;;  %vm311_vm7 = vcmask 15368  }
  0x50   :  { %v118_v20 = vunpack.c.0.s8 %v116_v15  ;;  %81 = vst.msk [vmem:[#allocation3] sm:$0xff] %vm78_vm0, %v680_v37  ;;  %82 = vst.msk [vmem:[#allocation3 + $0x8] sm:$0xff] %vm78_vm0, %v680_v37  ;;  %491 = vmatpush3.bf16.msra.mxu0 %v528_v38  ;;  %s681_s3 = smov 120   ;;  %vm682_vm8 = vmmov 0   ;;  %vm239_vm9 = vcmask 64512   ;;  %vm385_vm10 = vcmask 130112  }
  0x51   :  { %102 = vperm.xlu0 %519, %v91_v3   ;;  %250 = vperm.xlu1 %520, %v91_v3   ;;  %vm119_vm4 = vcmp.ne.s32.totalorder %v117_v12, 0  ;;  %vm453_vm12 = vcmask 125952   ;;  %s683_s15 = smov [#allocation13]  }
  0x52   :  { %vm120_vm5 = vcmp.ne.s32.totalorder %v118_v20, 0  ;;  %498 = vmatprep.mubr.msk.bf16.mxu1 %vm682_vm8, %v680_v37  ;;  %492 = vmatprep.mubr.msk.bf16.mxu0 %vm682_vm8, %v680_v37  ;;  %s461_s16 = sshll.u32 %s683_s15, 4  ;;  %s462_s16 = int_to_ptr.vmem [resolvable:$true] %s461_s16 }
  0x53   :  { %s637_s17 = scalar_lea.vmem %s462_s16, 128  ;;  %p642_p5 = scmp.lt.s32.totalorder %s462_s16, %s462_s16 }
  0x54   :  { %v789_v39 = vld [vmem:[#allocation2] sm:$0xff]  ;;  %v124_v42 = vld [vmem:[#allocation2 + $0x8] sm:$0xff]  ;;  %p638_p4 = scmp.ne.s32.totalorder %s462_s16, %s637_s17  ;;  %p643_p6 = scmp.lt.s32.totalorder %s637_s17, %s637_s17 }
  0x55   :  { %521 = vset.pattern.permute.xlu0 %v678_v1 }
  0x56   :  { %p644_p7 = por %p643_p6, %p642_p5 }
  0x58   :  { %p645_p8 = pnand %p644_p7, %p638_p4 }
  0xcc   :  { %v98_v10 = vpop.permute.xlu0 %97  ;;  %v247_v11 = vpop.permute.xlu1 %246 }
  0xcd   :  { %v109_v13 = vadd.f32 %v475_v8, %v98_v10  ;;  %v257_v14 = vadd.f32 %v478_v9, %v247_v11 }
  0xcf   :  { %v111_v16 = vmul.f32 0.01, %v109_v13  ;;  %v259_v17 = vmul.f32 0.01, %v257_v14 }
  0xd0   :  { %v103_v18 = vpop.permute.xlu0 %102  ;;  %v251_v19 = vpop.permute.xlu1 %250 }
  0xd1   :  { %v113_v21 = vmax.f32 %v109_v13, %v111_v16  ;;  %v261_v22 = vmax.f32 %v257_v14, %v259_v17  ;;  %v110_v23 = vadd.f32 %v475_v8, %v103_v18  ;;  %v258_v24 = vadd.f32 %v478_v9, %v251_v19 }
  0xd3   :  { %v112_v25 = vmul.f32 0.01, %v110_v23  ;;  %v260_v26 = vmul.f32 0.01, %v258_v24  ;;  %v775_v27 = vsel %vm119_vm4, %v113_v21, -1e+30 }
  0xd4   :  { %v126_v28 = vsel %vm83_vm3, %v775_v27, -inf  ;;  %v263_v29 = vsel %vm119_vm4, %v261_v22, -1e+30 }
  0xd5   :  { %v114_v30 = vmax.f32 %v110_v23, %v112_v25  ;;  %v262_v31 = vmax.f32 %v258_v24, %v260_v26  ;;  %127 = vmax.xlane.f32.xlu0 %v126_v28  ;;  %v267_v32 = vsel %vm83_vm3, %v263_v29, -inf  ;;  %v165_v24 = vld [vmem:[#allocation3 + $0x8] sm:$0xff]  ;;  %v164_v25 = vld [vmem:[#allocation3] sm:$0xff] }
  0xd7   :  { %v780_v33 = vsel %vm120_vm5, %v114_v30, -1e+30  ;;  %v264_v34 = vsel %vm120_vm5, %v262_v31, -1e+30 }
  0xd8   :  { %v129_v35 = vsel %vm83_vm3, %v780_v33, -inf  ;;  %v270_v36 = vsel %vm83_vm3, %v264_v34, -inf }
  0xd9   :  { %130 = vmax.xlane.f32.xlu1 %v129_v35  ;;  %268 = vmax.xlane.f32.xlu0 %v267_v32 }
  0xdd   :  { %271 = vmax.xlane.f32.xlu0 %v270_v36 }
 0x162   :  { %v128_v40 = vpop.xlane.xlu0 %127 }
 0x163   :  { %v792_v41 = vmax.f32 %v789_v39, %v128_v40 }
 0x165   :  { %v134_v43 = vsub.f32 %v789_v39, %v792_v41  ;;  %242 = vst.msk [vmem:[#allocation2] sm:$0xff] %vm170_vm6, %v792_v41 }
 0x166   :  { %v131_v44 = vpop.xlane.xlu1 %130  ;;  %v269_v47 = vpop.xlane.xlu0 %268 }
 0x167   :  { %v133_v45 = vmax.f32 %v124_v42, %v131_v44  ;;  %v136_v17 = vmul.f32 1.442695, %v134_v43 }
 0x169   :  { %v135_v46 = vsub.f32 %v124_v42, %v133_v45  ;;  %243 = vst.msk [vmem:[#allocation2 + $0x8] sm:$0xff] %vm170_vm6, %v133_v45 }
 0x16a   :  { %v272_v51 = vpop.xlane.xlu0 %271 }
 0x16b   :  { %v138_v15 = vmul.f32 1.442695, %v135_v46 }
 0x16c   :  { %v265_v48 = vld [vmem:[#allocation2] sm:$0xff] }
 0x16d   :  { %v273_v49 = vmax.f32 %v265_v48, %v269_v47 }
 0x16f   :  { %v275_v50 = vsub.f32 %v265_v48, %v273_v49  ;;  %388 = vst.msk [vmem:[#allocation2] sm:$0xff] %vm311_vm7, %v273_v49  ;;  %283 = vperm.xlu1 %520, %v273_v49   ;;  %v173_v48 = vld [vmem:[#allocation4] sm:$0xff] }
 0x170   :  { %v266_v52 = vld [vmem:[#allocation2 + $0x8] sm:$0xff] }
 0x171   :  { %v274_v53 = vmax.f32 %v266_v52, %v272_v51  ;;  %v277_v18 = vmul.f32 1.442695, %v275_v50  ;;  %v174_v50 = vld [vmem:[#allocation4 + $0x8] sm:$0xff] }
 0x173   :  { %v276_v54 = vsub.f32 %v266_v52, %v274_v53  ;;  %389 = vst.msk [vmem:[#allocation2 + $0x8] sm:$0xff] %vm311_vm7, %v274_v53  ;;  %288 = vperm.xlu0 %521, %v274_v53   ;;  %328 = vrot.lane.b32.xlu1 %v528_v38, %s681_s3 }
 0x174   :  { %522 = vset.pattern.permute.xlu1 %v677_v0 }
 0x175   :  { %v279_v19 = vmul.f32 1.442695, %v276_v54 }
 0x177   :  { %142 = vperm.xlu1 %522, %v792_v41   ;;  %523 = vset.pattern.permute.xlu0 %v677_v0 }
 0x17b   :  { %147 = vperm.xlu1 %522, %v133_v45  }
 0x1ee   :  { %v284_v55 = vpop.permute.xlu1 %283 }
 0x1ef   :  { %v291_v58 = vsub.f32 %v263_v29, %v284_v55 }
 0x1f2   :  { %v289_v56 = vpop.permute.xlu0 %288  ;;  %v329_v57 = vpop.permute.xlu1 %328 }
 0x1f3   :  { %v292_v59 = vsub.f32 %v264_v34, %v289_v56  ;;  %497 = vmatpush3.bf16.msra.mxu1 %v329_v57 }
 0x1f5   :  { %v293_v60 = vpack.c.bf16 %v292_v59, %v291_v58 }
 0x1f6   :  { %v143_v61 = vpop.permute.xlu1 %142 }
 0x1f7   :  { %v295_v62 = vmul.bf16 1069105081, %v293_v60  ;;  %v150_v2 = vsub.f32 %v775_v27, %v143_v61 }
 0x1f9   :  { %529 = vpow.bf16 %v295_v62 }
 0x1fa   :  { %v148_v63 = vpop.permute.xlu1 %147 }
 0x1fb   :  { %v151_v3 = vsub.f32 %v780_v33, %v148_v63 }
 0x1fd   :  { %v152_v4 = vpack.c.bf16 %v151_v3, %v150_v2 }
 0x1ff   :  { %v154_v5 = vmul.bf16 1069105081, %v152_v4 }
 0x201   :  { %531 = vpow.bf16 %v154_v5 }
 0x202   :  { %533 = vpow2.f32 %v138_v15 }
 0x203   :  { %535 = vpow2.f32 %v136_v17 }
 0x204   :  { %v530_v6 = vpop.eup %529  ;;  %537 = vpow2.f32 %v277_v18 }
 0x205   :  { %499 = vmatmul.mubr.msk.bf16.vlgmr.msra.gmra.mrb[0].mxu1 %vm83_vm3, %v530_v6  ;;  %v297_v12 = vunpack.c.l.bf16 %v530_v6  ;;  %v298_v14 = vunpack.c.h.bf16 %v530_v6  ;;  %539 = vpow2.f32 %v279_v19 }
 0x207   :  { %v299_v13 = vsel %vm83_vm3, %v297_v12, 0.0  ;;  %v302_v16 = vsel %vm83_vm3, %v298_v14, 0.0 }
 0x20c   :  { %v532_v7 = vpop.eup %531 }
 0x20d   :  { %493 = vmatmul.mubr.msk.bf16.vlgmr.msra.gmra.mrb[0].mxu0 %vm83_vm3, %v532_v7  ;;  %v157_v8 = vunpack.c.h.bf16 %v532_v7  ;;  %v156_v9 = vunpack.c.l.bf16 %v532_v7  ;;  %v534_v20 = vpop.eup %533 }
 0x20e   :  { %v536_v21 = vpop.eup %535  ;;  %v167_v26 = vmul.f32 %v534_v20, %v165_v24 }
 0x20f   :  { %v161_v10 = vsel %vm83_vm3, %v157_v8, 0.0  ;;  %v158_v11 = vsel %vm83_vm3, %v156_v9, 0.0  ;;  %v538_v22 = vpop.eup %537  ;;  %v166_v27 = vmul.f32 %v536_v21, %v164_v25 }
 0x210   :  { %162 = vadd.xlane.f32.xlu0 %v161_v10  ;;  %159 = vadd.xlane.f32.xlu1 %v158_v11  ;;  %v540_v23 = vpop.eup %539 }
 0x214   :  { %300 = vadd.xlane.f32.xlu1 %v299_v13 }
 0x218   :  { %303 = vadd.xlane.f32.xlu1 %v302_v16 }
 0x226   :  { %182 = vperm.xlu0 %523, %v534_v20  }
 0x229   :  { %177 = vperm.xlu1 %522, %v536_v21  }
 0x22a   :  { %527 = vset.pattern.permute.xlu0 %v678_v1 }
 0x22d   :  { %524 = vset.pattern.permute.xlu1 %v678_v1 }
 0x22e   :  { %318 = vperm.xlu1 %524, %v538_v22  }
 0x232   :  { %323 = vperm.xlu1 %524, %v540_v23  }
 0x236   :  { %525 = vset.pattern.permute.xlu1 %v677_v0 }
 0x29d   :  { %v163_v28 = vpop.xlane.xlu0 %162  ;;  %v160_v29 = vpop.xlane.xlu1 %159 }
 0x29e   :  { %v169_v30 = vadd.f32 %v167_v26, %v163_v28  ;;  %v168_v31 = vadd.f32 %v166_v27, %v160_v29 }
 0x2a0   :  { %172 = vst.msk [vmem:[#allocation3 + $0x8] sm:$0xff] %vm170_vm6, %v169_v30  ;;  %171 = vst.msk [vmem:[#allocation3] sm:$0xff] %vm170_vm6, %v168_v31 }
 0x2a1   :  { %v301_v32 = vpop.xlane.xlu1 %300 }
 0x2a5   :  { %v304_v37 = vpop.xlane.xlu1 %303  ;;  %v183_v51 = vpop.permute.xlu0 %182 }
 0x2a6   :  { %v186_v55 = vmul.f32 %v183_v51, %v174_v50 }
 0x2a7   :  { %v305_v33 = vld [vmem:[#allocation3] sm:$0xff]  ;;  %v306_v34 = vld [vmem:[#allocation3 + $0x8] sm:$0xff] }
 0x2a8   :  { %v307_v35 = vmul.f32 %v538_v22, %v305_v33  ;;  %v308_v36 = vmul.f32 %v540_v23, %v306_v34 }
 0x2a9   :  { %v178_v49 = vpop.permute.xlu1 %177 }
 0x2aa   :  { %v309_v38 = vadd.f32 %v307_v35, %v301_v32  ;;  %v310_v0 = vadd.f32 %v308_v36, %v304_v37  ;;  %v185_v52 = vmul.f32 %v178_v49, %v173_v48 }
 0x2ac   :  { %312 = vst.msk [vmem:[#allocation3] sm:$0xff] %vm311_vm7, %v309_v38  ;;  %313 = vst.msk [vmem:[#allocation3 + $0x8] sm:$0xff] %vm311_vm7, %v310_v0 }
 0x2ad   :  { %v319_v61 = vpop.permute.xlu1 %318 }
 0x2b1   :  { %v324_v62 = vpop.permute.xlu1 %323 }
 0x2b3   :  { %v393_v39 = vld [vmem:[#allocation3] sm:$0xff]  ;;  %v394_v42 = vld [vmem:[#allocation3 + $0x8] sm:$0xff] }
 0x2b4   :  { %v395_v40 = vmax.f32 %v393_v39, 1e-30  ;;  %v396_v43 = vmax.f32 %v394_v42, 1e-30 }
 0x2b6   :  { %541 = vrcp.f32 %v395_v40 }
 0x2b7   :  { %543 = vrcp.f32 %v396_v43 }
 0x2c0   :  { %v542_v41 = vpop.eup %541 }
 0x2c1   :  { %405 = vperm.xlu1 %525, %v542_v41   ;;  %v544_v53 = vpop.eup %543 }
 0x2d8   :  { %v368_v44 = vpop.f32.mrb[0].mxu1 }
 0x2d9   :  { %v500_v45 = vpop.f32.mrb[1].mxu1  ;;  %377 = vrot.lane.b32.xlu1 %v368_v44, %s673_s18 }
 0x2da   :  { %v371_v46 = vpop.f32.mrb[2].mxu1 }
 0x2db   :  { %v501_v47 = vpop.f32.mrb[3].mxu1 }
 0x2dd   :  { %379 = vrot.lane.b32.xlu1 %v371_v46, %s673_s18 }
 0x2e0   :  { %v230_v54 = vpop.f32.mrb[0].mxu0 }
 0x2e1   :  { %v237_v56 = vadd.f32 %v230_v54, %v185_v52  ;;  %v494_v57 = vpop.f32.mrb[1].mxu0  ;;  %410 = vperm.xlu1 %525, %v544_v53  }
 0x2e2   :  { %v233_v58 = vpop.f32.mrb[2].mxu0 }
 0x2e3   :  { %240 = vst.msk [vmem:[#allocation4] sm:$0xff] %vm239_vm9, %v237_v56  ;;  %v238_v59 = vadd.f32 %v233_v58, %v186_v55  ;;  %v495_v60 = vpop.f32.mrb[3].mxu0 }
 0x2e5   :  { %241 = vst.msk [vmem:[#allocation4 + $0x8] sm:$0xff] %vm239_vm9, %v238_v59  ;;  %526 = vset.pattern.permute.xlu1 %v678_v1 }
 0x2e6   :  { %420 = vperm.xlu1 %526, %v542_v41  }
 0x2ea   :  { %424 = vperm.xlu1 %526, %v544_v53   ;;  %v314_v2 = vld [vmem:[#allocation4] sm:$0xff] }
 0x2eb   :  { %v326_v3 = vmul.f32 %v319_v61, %v314_v2 }
 0x2ec   :  { %v315_v5 = vld [vmem:[#allocation4 + $0x8] sm:$0xff] }
 0x2ed   :  { %v327_v7 = vmul.f32 %v324_v62, %v315_v5 }
 0x340   :  { %v406_v63 = vpop.permute.xlu1 %405 }
 0x34b   :  { %v378_v4 = vpop.permute.xlu1 %377 }
 0x34c   :  { %v383_v6 = vadd.f32 %v378_v4, %v326_v3 }
 0x34e   :  { %386 = vst.msk [vmem:[#allocation4] sm:$0xff] %vm385_vm10, %v383_v6 }
 0x34f   :  { %v380_v8 = vpop.permute.xlu1 %379 }
 0x350   :  { %v384_v9 = vadd.f32 %v380_v8, %v327_v7 }
 0x352   :  { %387 = vst.msk [vmem:[#allocation4 + $0x8] sm:$0xff] %vm385_vm10, %v384_v9 }
 0x355   :  { %v401_v10 = vld [vmem:[#allocation4] sm:$0xff] }
 0x356   :  { %v413_v1 = vmul.f32 %v406_v63, %v401_v10 }
 0x358   :  { %415 = vst.msk [vmem:[#allocation4] sm:$0xff] %vm239_vm9, %v413_v1 }
 0x359   :  { %v402_v11 = vld [vmem:[#allocation4 + $0x8] sm:$0xff] }
 0x35f   :  { %v417_v14 = vld [vmem:[#allocation4] sm:$0xff] }
 0x360   :  { %v411_v12 = vpop.permute.xlu1 %410 }
 0x361   :  { %v414_v13 = vmul.f32 %v411_v12, %v402_v11 }
 0x363   :  { %416 = vst.msk [vmem:[#allocation4 + $0x8] sm:$0xff] %vm239_vm9, %v414_v13 }
 0x365   :  { %v421_v15 = vpop.permute.xlu1 %420 }
 0x366   :  { %v427_v16 = vmul.f32 %v421_v15, %v417_v14 }
 0x368   :  { %429 = vst.msk [vmem:[#allocation4] sm:$0xff] %vm385_vm10, %v427_v16 }
 0x369   :  { %v425_v17 = vpop.permute.xlu1 %424 }
 0x36a   :  { %v418_v18 = vld [vmem:[#allocation4 + $0x8] sm:$0xff] }
 0x36b   :  { %v428_v19 = vmul.f32 %v425_v17, %v418_v18 }
 0x36d   :  { %430 = vst.msk [vmem:[#allocation4 + $0x8] sm:$0xff] %vm385_vm10, %v428_v19 }
 0x36f   :  { %v431_v20 = vld [vmem:[#allocation4] sm:$0xff] }
 0x370   :  { %v435_v21 = vmin.f32 %v431_v20, 0.0  ;;  %vm433_vm11 = vcmp.gt.f32.partialorder %v431_v20, 0.0 }
 0x372   :  { %v437_v22 = vmul.f32 1.442695, %v435_v21 }
 0x374   :  { %v432_v23 = vld [vmem:[#allocation4 + $0x8] sm:$0xff]  ;;  %545 = vpow2.f32 %v437_v22 }
 0x375   :  { %v436_v24 = vmin.f32 %v432_v23, 0.0  ;;  %vm434_vm13 = vcmp.gt.f32.partialorder %v432_v23, 0.0 }
 0x377   :  { %v439_v25 = vmul.f32 1.442695, %v436_v24 }
 0x379   :  { %547 = vpow2.f32 %v439_v25 }
 0x37e   :  { %v546_v26 = vpop.eup %545 }
 0x37f   :  { %v480_v27 = vadd.f32 -1.0, %v546_v26 }
 0x381   :  { %v443_v28 = vsel %vm433_vm11, %v431_v20, %v480_v27 }
 0x382   :  { %v484_v29 = vpack.c.bf16 %v443_v28, %v443_v28 }
 0x383   :  { %v548_v30 = vpop.eup %547 }
 0x384   :  { %v481_v31 = vadd.f32 -1.0, %v548_v30  ;;  %454 = vst.msk [vmem:[#allocation13] sm:$0xf] %vm453_vm12, %v484_v29 }
 0x386   :  { %v444_v32 = vsel %vm434_vm13, %v432_v23, %v481_v31 }
 0x387   :  { %v485_v33 = vpack.c.bf16 %v444_v32, %v444_v32 }
 0x389   :  { %455 = vst.msk [vmem:[#allocation13 + $0x4] sm:$0xf] %vm453_vm12, %v485_v33 }
 0x38a   :  { %648 = shalt.err (!%p645_p8)
}
 0x38b   :  { %s649_s21 = scalar_lea.hbm %s849_s4, 128 }
 0x38c   :  { %p650_p9 = scmp.ne.s32.totalorder %s849_s4, %s649_s21  ;;  %p653_p10 = scmp.lt.u32.totalorder %s649_s21, %s849_s4 }
 0x38e   :  { %p655_p11 = pnand %p653_p10, %p650_p9 }
 0x390   :  { %658 = shalt.err (!%p655_p11)
}
 0x391   :  { %467 = dma.vmem_to_hbm [thread:$0]  %s462_s16, 128, %s849_s4, [#allocation7], %s669_s1, %s669_s1, %s670_s11  }
 0x392   :  { %665 = dma.done.wait [#allocation7], 128  }
 0x393   :  { %666 = vsyncadd [#allocation7], 4294967168 }
 0x394   :  { %471 = vsyncpa [#allocation6], 1 }
 0x395   :  { %472 = vsyncpa [#allocation9], 1 }
 0x396   :  { %473 = vsyncpa [#allocation12], 1 }
 0x397   :  { %474 = vsyncpa [#allocation7], 1 }

// kernel: gat_forward.7
= control target key start
LH: loop header
LB: loop body
LE: loop exit
PB: predicated region body
PF: predicated region fallthrough
CT: control target
= control target key end

     0   :  { %9 = vsyncpa [#allocation6], 0  ;;  %s587_s0 = inlined_call_operand.hbm [shape: bf16[16,4], index: 0, kind: input, shape index: {}]   ;;  %s588_s1 = inlined_call_operand.hbm [shape: f32[1,16], index: 1, kind: input, shape index: {}]   ;;  %s589_s2 = inlined_call_operand.hbm [shape: f32[16,1], index: 2, kind: input, shape index: {}]   ;;  %s590_s3 = inlined_call_operand.hbm [shape: s8[16,16], index: 3, kind: input, shape index: {}]   ;;  %s591_s4 = inlined_call_operand.hbm [shape: f32[16,4], index: 4, kind: output, shape index: {}]  }
   0x1   :  { %10 = vsyncpa [#allocation9], 0 }
   0x2   :  { %11 = vsyncpa [#allocation12], 0 }
   0x3   :  { %12 = vsyncpa [#allocation7], 0  ;;  %s453_s15 = smov [#allocation8]   ;;  %s454_s17 = smov [#allocation5]  }
   0x4   :  { %s31_s16 = sshll.u32 %s453_s15, 4  ;;  %s18_s18 = sshll.u32 %s454_s17, 4  ;;  %s32_s16 = int_to_ptr.vmem [resolvable:$true] %s31_s16  ;;  %s493_s18 = int_to_ptr.vmem [resolvable:$true] %s18_s18 }
   0x5   :  { %s335_s21 = scalar_lea.hbm %s588_s1, 16 }
   0x6   :  { %p336_p0 = scmp.ne.s32.totalorder %s588_s1, %s335_s21  ;;  %p339_p1 = scmp.lt.u32.totalorder %s335_s21, %s588_s1 }
   0x8   :  { %p341_p2 = pnand %p339_p1, %p336_p0 }
   0xa   :  { %344 = shalt.err (!%p341_p2)
}
   0xb   :  { %s345_s26 = scalar_lea.vmem %s32_s16, 16  ;;  %s349_s27 = scalar_lea.vmem %s32_s16, 32 }
   0xc   :  { %p346_p3 = scmp.ne.s32.totalorder %s32_s16, %s345_s26  ;;  %p350_p4 = scmp.lt.s32.totalorder %s32_s16, %s32_s16 }
   0xd   :  { %p351_p5 = scmp.lt.s32.totalorder %s349_s27, %s345_s26 }
   0xf   :  { %p352_p6 = por %p351_p5, %p350_p4 }
  0x11   :  { %p353_p7 = pnand %p352_p6, %p346_p3 }
  0x13   :  { %356 = shalt.err (!%p353_p7)
}
  0x14   :  { %34 = dma.hbm_to_vmem [thread:$0]  %s588_s1, 16, %s32_s16, [#allocation9]  }
  0x15   :  { %s357_s6 = scalar_lea.hbm %s587_s0, 128 }
  0x16   :  { %p358_p8 = scmp.ne.s32.totalorder %s587_s0, %s357_s6  ;;  %p361_p9 = scmp.lt.u32.totalorder %s357_s6, %s587_s0 }
  0x18   :  { %p363_p10 = pnand %p361_p9, %p358_p8 }
  0x1a   :  { %366 = shalt.err (!%p363_p10)
}
  0x1b   :  { %s367_s11 = scalar_lea.vmem %s493_s18, 128  ;;  %p372_p12 = scmp.lt.s32.totalorder %s493_s18, %s493_s18 }
  0x1c   :  { %p368_p11 = scmp.ne.s32.totalorder %s493_s18, %s367_s11  ;;  %p373_p13 = scmp.lt.s32.totalorder %s367_s11, %s367_s11 }
  0x1e   :  { %p374_p0 = por %p373_p13, %p372_p12 }
  0x20   :  { %p375_p1 = pnand %p374_p0, %p368_p11 }
  0x22   :  { %378 = shalt.err (!%p375_p1)
}
  0x23   :  { %s455_s1 = smov 64   ;;  %s456_s12 = smov 4  }
  0x24   :  { %24 = dma.hbm_to_vmem [thread:$0]  %s587_s0, 128, %s493_s18, [#allocation6], %s455_s1, %s455_s1, %s456_s12  }
  0x25   :  { %s457_s15 = smov [#allocation10]   ;;  %s379_s20 = scalar_lea.hbm %s589_s2, 256 }
  0x26   :  { %s40_s16 = sshll.u32 %s457_s15, 4  ;;  %p380_p2 = scmp.ne.s32.totalorder %s589_s2, %s379_s20  ;;  %s41_s16 = int_to_ptr.vmem [resolvable:$true] %s40_s16 }
  0x27   :  { %p383_p3 = scmp.lt.u32.totalorder %s379_s20, %s589_s2 }
  0x29   :  { %p385_p4 = pnand %p383_p3, %p380_p2 }
  0x2b   :  { %388 = shalt.err (!%p385_p4)
}
  0x2c   :  { %s389_s25 = scalar_lea.vmem %s41_s16, 256  ;;  %p394_p6 = scmp.lt.s32.totalorder %s41_s16, %s41_s16 }
  0x2d   :  { %p390_p5 = scmp.ne.s32.totalorder %s41_s16, %s389_s25  ;;  %p395_p7 = scmp.lt.s32.totalorder %s389_s25, %s389_s25 }
  0x2f   :  { %p396_p8 = por %p395_p7, %p394_p6 }
  0x31   :  { %p397_p9 = pnand %p396_p8, %p390_p5 }
  0x33   :  { %400 = shalt.err (!%p397_p9)
}
  0x34   :  { %s458_s0 = smov 128   ;;  %s459_s18 = smov 8  }
  0x35   :  { %46 = dma.hbm_to_vmem [thread:$0]  %s589_s2, 256, %s41_s16, [#allocation9], %s458_s0, %s458_s0, %s459_s18  }
  0x36   :  { %s460_s28 = smov [#allocation11]   ;;  %s401_s6 = scalar_lea.hbm %s590_s3, 64 }
  0x37   :  { %s52_s29 = sshll.u32 %s460_s28, 4  ;;  %p402_p10 = scmp.ne.s32.totalorder %s590_s3, %s401_s6  ;;  %s53_s29 = int_to_ptr.vmem [resolvable:$true] %s52_s29 }
  0x38   :  { %p405_p11 = scmp.lt.u32.totalorder %s401_s6, %s590_s3 }
  0x3a   :  { %p407_p12 = pnand %p405_p11, %p402_p10 }
  0x3c   :  { %410 = shalt.err (!%p407_p12)
}
  0x3d   :  { %s411_s11 = scalar_lea.vmem %s53_s29, 64  ;;  %p416_p0 = scmp.lt.s32.totalorder %s53_s29, %s53_s29 }
  0x3e   :  { %p412_p13 = scmp.ne.s32.totalorder %s53_s29, %s411_s11  ;;  %p417_p1 = scmp.lt.s32.totalorder %s411_s11, %s411_s11 }
  0x40   :  { %p418_p2 = por %p417_p1, %p416_p0 }
  0x42   :  { %p419_p3 = pnand %p418_p2, %p412_p13 }
  0x44   :  { %422 = shalt.err (!%p419_p3)
}
  0x45   :  { %s461_s2 = smov 32   ;;  %s462_s1 = smov 2  }
  0x46   :  { %58 = dma.hbm_to_vmem [thread:$0]  %s590_s3, 64, %s53_s29, [#allocation12], %s461_s2, %s461_s2, %s462_s1  }
  0x47   :  { %445 = dma.done.wait [#allocation6], 128  }
  0x48   :  { %446 = vsyncadd [#allocation6], 4294967168 }
  0x49   :  { %447 = dma.done.wait [#allocation9], 272  }
  0x4a   :  { %448 = vsyncadd [#allocation9], 4294967024 }
  0x4b   :  { %449 = dma.done.wait [#allocation12], 64  }
  0x4c   :  { %450 = vsyncadd [#allocation12], 4294967232  ;;  %v463_v0 = vmov 0   ;;  %v90_v1 = vld [vmem:[#allocation10] sm:$0xff]  ;;  %v91_v2 = vld [vmem:[#allocation10 + $0x8] sm:$0xff]  ;;  %vm78_vm0 = vcmask 7168  }
  0x4d   :  { %322 = vset.pattern.permute.xlu0 %v463_v0  ;;  %323 = vset.pattern.permute.xlu1 %v463_v0  ;;  %v464_v3 = vmov -1e+30   ;;  %v86_v4 = vld [vmem:[#allocation11] sm:$0x3]  ;;  %v87_v5 = vld [vmem:[#allocation11 + $0x2] sm:$0x3] }
  0x4e   :  { %97 = vperm.xlu0 %322, %v90_v1   ;;  %79 = vst.msk [vmem:[#allocation2] sm:$0xff] %vm78_vm0, %v464_v3  ;;  %80 = vst.msk [vmem:[#allocation2 + $0x8] sm:$0xff] %vm78_vm0, %v464_v3  ;;  %vm88_vm1 = vnez %v86_v4  ;;  %v296_v7 = vld [vmem:[#allocation8] ss:$0 sm:$0xff]  ;;  %vm89_vm2 = vnez %v87_v5  ;;  %vm127_vm4 = vcmask 130048   ;;  %v465_v23 = vmov 0.0  }
  0x4f   :  { %v117_v6 = vsel %vm88_vm1, 16843009, %v463_v0  ;;  %v118_v11 = vsel %vm89_vm2, 16843009, %v463_v0  ;;  %301 = vmatprep.subr.bf16.mxu0 %v465_v23  ;;  %81 = vst.msk [vmem:[#allocation3] sm:$0xff] %vm78_vm0, %v465_v23  ;;  %82 = vst.msk [vmem:[#allocation3 + $0x8] sm:$0xff] %vm78_vm0, %v465_v23 }
  0x50   :  { %v119_v9 = vunpack.c.0.s8 %v117_v6  ;;  %v120_v14 = vunpack.c.0.s8 %v118_v11  ;;  %vm83_vm6 = vcmask 31744   ;;  %v324_v32 = vld [vmem:[#allocation5] sm:$0xff]   ;;  %vm466_vm7 = vmmov 0   ;;  %s467_s3 = smov [#allocation13]  }
  0x51   :  { %84 = vst.msk [vmem:[#allocation4] sm:$0xff] %vm83_vm6, %v465_v23  ;;  %85 = vst.msk [vmem:[#allocation4 + $0x8] sm:$0xff] %vm83_vm6, %v465_v23  ;;  %303 = vmatprep.mubr.msk.bf16.mxu0 %vm466_vm7, %v465_v23  ;;  %302 = vmatpush3.bf16.msra.mxu0 %v324_v32  ;;  %s282_s14 = sshll.u32 %s467_s3, 4  ;;  %s283_s14 = int_to_ptr.vmem [resolvable:$true] %s282_s14 }
  0x52   :  { %102 = vperm.xlu0 %322, %v91_v2   ;;  %vm121_vm3 = vcmp.ne.s32.totalorder %v119_v9, 0  ;;  %vm122_vm5 = vcmp.ne.s32.totalorder %v120_v14, 0  ;;  %s423_s15 = scalar_lea.vmem %s283_s14, 256  ;;  %p428_p5 = scmp.lt.s32.totalorder %s283_s14, %s283_s14 }
  0x53   :  { %p424_p4 = scmp.ne.s32.totalorder %s283_s14, %s423_s15  ;;  %p429_p6 = scmp.lt.s32.totalorder %s423_s15, %s423_s15 }
  0x55   :  { %v125_v24 = vld [vmem:[#allocation2] sm:$0xff]  ;;  %v126_v27 = vld [vmem:[#allocation2 + $0x8] sm:$0xff]  ;;  %p430_p7 = por %p429_p6, %p428_p5 }
  0x56   :  { %v167_v48 = vld [vmem:[#allocation3 + $0x8] sm:$0xff]  ;;  %v166_v49 = vld [vmem:[#allocation3] sm:$0xff] }
  0x57   :  { %p431_p8 = pnand %p430_p7, %p424_p4 }
  0x58   :  { %v175_v62 = vld [vmem:[#allocation4] sm:$0xff]  ;;  %v176_v0 = vld [vmem:[#allocation4 + $0x8] sm:$0xff] }
  0xcd   :  { %v98_v8 = vpop.permute.xlu0 %97 }
  0xce   :  { %v111_v10 = vadd.f32 %v296_v7, %v98_v8 }
  0xd0   :  { %v113_v12 = vmul.f32 0.01, %v111_v10 }
  0xd1   :  { %v103_v13 = vpop.permute.xlu0 %102 }
  0xd2   :  { %v115_v15 = vmax.f32 %v111_v10, %v113_v12  ;;  %v112_v16 = vadd.f32 %v296_v7, %v103_v13 }
  0xd4   :  { %v114_v17 = vmul.f32 0.01, %v112_v16  ;;  %v123_v18 = vsel %vm121_vm3, %v115_v15, -1e+30 }
  0xd5   :  { %v128_v19 = vsel %vm127_vm4, %v123_v18, -inf }
  0xd6   :  { %v116_v20 = vmax.f32 %v112_v16, %v114_v17  ;;  %129 = vmax.xlane.f32.xlu1 %v128_v19 }
  0xd8   :  { %v124_v21 = vsel %vm122_vm5, %v116_v20, -1e+30 }
  0xd9   :  { %v131_v22 = vsel %vm127_vm4, %v124_v21, -inf }
  0xda   :  { %132 = vmax.xlane.f32.xlu1 %v131_v22 }
 0x163   :  { %v130_v25 = vpop.xlane.xlu1 %129 }
 0x164   :  { %v134_v26 = vmax.f32 %v125_v24, %v130_v25 }
 0x166   :  { %v136_v28 = vsub.f32 %v125_v24, %v134_v26  ;;  %244 = vst.msk [vmem:[#allocation2] sm:$0xff] %vm78_vm0, %v134_v26  ;;  %144 = vperm.xlu0 %322, %v134_v26  }
 0x167   :  { %v133_v29 = vpop.xlane.xlu1 %132 }
 0x168   :  { %v135_v30 = vmax.f32 %v126_v27, %v133_v29  ;;  %v138_v45 = vmul.f32 1.442695, %v136_v28 }
 0x16a   :  { %v137_v31 = vsub.f32 %v126_v27, %v135_v30  ;;  %245 = vst.msk [vmem:[#allocation2 + $0x8] sm:$0xff] %vm78_vm0, %v135_v30  ;;  %149 = vperm.xlu1 %323, %v135_v30  }
 0x16c   :  { %v140_v44 = vmul.f32 1.442695, %v137_v31 }
 0x1e5   :  { %v145_v33 = vpop.permute.xlu0 %144 }
 0x1e6   :  { %v152_v35 = vsub.f32 %v123_v18, %v145_v33 }
 0x1e9   :  { %v150_v34 = vpop.permute.xlu1 %149 }
 0x1ea   :  { %v153_v36 = vsub.f32 %v124_v21, %v150_v34 }
 0x1ec   :  { %v154_v37 = vpack.c.bf16 %v153_v36, %v152_v35 }
 0x1ee   :  { %v156_v38 = vmul.bf16 1069105081, %v154_v37 }
 0x1f0   :  { %325 = vpow.bf16 %v156_v38 }
 0x1f1   :  { %327 = vpow2.f32 %v140_v44 }
 0x1f2   :  { %329 = vpow2.f32 %v138_v45 }
 0x1fb   :  { %v326_v39 = vpop.eup %325 }
 0x1fc   :  { %304 = vmatmul.mubr.msk.bf16.vlgmr.msra.gmra.mrb[0].mxu0 %vm127_vm4, %v326_v39  ;;  %v159_v40 = vunpack.c.h.bf16 %v326_v39  ;;  %v158_v41 = vunpack.c.l.bf16 %v326_v39  ;;  %v328_v46 = vpop.eup %327 }
 0x1fd   :  { %v330_v47 = vpop.eup %329  ;;  %v169_v50 = vmul.f32 %v328_v46, %v167_v48 }
 0x1fe   :  { %v163_v42 = vsel %vm127_vm4, %v159_v40, 0.0  ;;  %v160_v43 = vsel %vm127_vm4, %v158_v41, 0.0  ;;  %v168_v51 = vmul.f32 %v330_v47, %v166_v49 }
 0x1ff   :  { %164 = vadd.xlane.f32.xlu1 %v163_v42  ;;  %161 = vadd.xlane.f32.xlu0 %v160_v43 }
 0x210   :  { %184 = vperm.xlu1 %323, %v328_v46  }
 0x215   :  { %179 = vperm.xlu0 %322, %v330_v47  }
 0x28c   :  { %v165_v52 = vpop.xlane.xlu1 %164  ;;  %v162_v53 = vpop.xlane.xlu0 %161 }
 0x28d   :  { %v171_v54 = vadd.f32 %v169_v50, %v165_v52  ;;  %v170_v55 = vadd.f32 %v168_v51, %v162_v53 }
 0x28f   :  { %174 = vst.msk [vmem:[#allocation3 + $0x8] sm:$0xff] %vm78_vm0, %v171_v54  ;;  %173 = vst.msk [vmem:[#allocation3] sm:$0xff] %vm78_vm0, %v170_v55 }
 0x290   :  { %v185_v1 = vpop.permute.xlu1 %184 }
 0x291   :  { %v188_v4 = vmul.f32 %v185_v1, %v176_v0 }
 0x294   :  { %v180_v63 = vpop.permute.xlu0 %179 }
 0x295   :  { %v187_v2 = vmul.f32 %v180_v63, %v175_v62 }
 0x296   :  { %v249_v56 = vld [vmem:[#allocation3] sm:$0xff]  ;;  %v250_v57 = vld [vmem:[#allocation3 + $0x8] sm:$0xff] }
 0x297   :  { %v251_v58 = vmax.f32 %v249_v56, 1e-30  ;;  %v252_v59 = vmax.f32 %v250_v57, 1e-30 }
 0x299   :  { %331 = vrcp.f32 %v251_v58 }
 0x29a   :  { %333 = vrcp.f32 %v252_v59 }
 0x2a3   :  { %v332_v60 = vpop.eup %331 }
 0x2a4   :  { %261 = vperm.xlu0 %322, %v332_v60   ;;  %v334_v61 = vpop.eup %333 }
 0x2a8   :  { %266 = vperm.xlu0 %322, %v334_v61  }
 0x2cf   :  { %v232_v3 = vpop.f32.mrb[0].mxu0 }
 0x2d0   :  { %v239_v5 = vadd.f32 %v232_v3, %v187_v2  ;;  %v305_v6 = vpop.f32.mrb[1].mxu0 }
 0x2d1   :  { %v235_v7 = vpop.f32.mrb[2].mxu0 }
 0x2d2   :  { %242 = vst.msk [vmem:[#allocation4] sm:$0xff] %vm83_vm6, %v239_v5  ;;  %v240_v8 = vadd.f32 %v235_v7, %v188_v4  ;;  %v306_v9 = vpop.f32.mrb[3].mxu0 }
 0x2d4   :  { %243 = vst.msk [vmem:[#allocation4 + $0x8] sm:$0xff] %vm83_vm6, %v240_v8 }
 0x2d9   :  { %v257_v10 = vld [vmem:[#allocation4] sm:$0xff] }
 0x2db   :  { %v258_v13 = vld [vmem:[#allocation4 + $0x8] sm:$0xff] }
 0x323   :  { %v262_v11 = vpop.permute.xlu0 %261 }
 0x324   :  { %v269_v12 = vmul.f32 %v262_v11, %v257_v10 }
 0x326   :  { %271 = vst.msk [vmem:[#allocation4] sm:$0xff] %vm83_vm6, %v269_v12 }
 0x327   :  { %v267_v14 = vpop.permute.xlu0 %266 }
 0x328   :  { %v270_v15 = vmul.f32 %v267_v14, %v258_v13 }
 0x32a   :  { %272 = vst.msk [vmem:[#allocation4 + $0x8] sm:$0xff] %vm83_vm6, %v270_v15 }
 0x32d   :  { %v273_v16 = vld [vmem:[#allocation4] sm:$0xff] }
 0x32e   :  { %275 = vst.msk [vmem:[#allocation13] sm:$0xff] %vm83_vm6, %v273_v16 }
 0x331   :  { %v274_v17 = vld [vmem:[#allocation4 + $0x8] sm:$0xff] }
 0x332   :  { %276 = vst.msk [vmem:[#allocation13 + $0x8] sm:$0xff] %vm83_vm6, %v274_v17 }
 0x333   :  { %434 = shalt.err (!%p431_p8)
}
 0x334   :  { %s435_s19 = scalar_lea.hbm %s591_s4, 256 }
 0x335   :  { %p436_p9 = scmp.ne.s32.totalorder %s591_s4, %s435_s19  ;;  %p439_p10 = scmp.lt.u32.totalorder %s435_s19, %s591_s4 }
 0x337   :  { %p441_p11 = pnand %p439_p10, %p436_p9 }
 0x339   :  { %444 = shalt.err (!%p441_p11)
}
 0x33a   :  { %288 = dma.vmem_to_hbm [thread:$0]  %s283_s14, 256, %s591_s4, [#allocation7], %s458_s0, %s458_s0, %s459_s18  }
 0x33b   :  { %451 = dma.done.wait [#allocation7], 256  }
 0x33c   :  { %452 = vsyncadd [#allocation7], 4294967040 }
 0x33d   :  { %292 = vsyncpa [#allocation6], 1 }
 0x33e   :  { %293 = vsyncpa [#allocation9], 1 }
 0x33f   :  { %294 = vsyncpa [#allocation12], 1 }
 0x340   :  { %295 = vsyncpa [#allocation7], 1 }

</bundles_post_ra>
